<compile_context>
chip_gen: v5e
topology: v5e:2x2
jax: 0.10.0
libtpu: 0.0.40
codegen_flags: <defaults>
</compile_context>

<pallas_src>
import jax
import jax.numpy as jnp
from jax.experimental import pallas as pl
from jax.experimental.pallas import tpu as pltpu


def _vmem_spec():
    return pl.BlockSpec(memory_space=pltpu.MemorySpace.VMEM)


# --------------------------------------------------------------------------
# Fused LSTM-classifier kernel
# --------------------------------------------------------------------------
def lstm_classifier_kernel(x_ref, wih_ref, bih_ref, whh_ref,
                           w1_ref, b1_ref, w2_ref, b2_ref, w3_ref, out_ref):
    B, T, D = x_ref.shape
    H = whh_ref.shape[0]
    H2, H3, H4 = 2 * H, 3 * H, 4 * H

    # ---- hoisted input projection for BOTH directions: one big matmul ----
    # x: (B, T, D) -> (B*T, D);  wih: (D, 8H) = [fwd i,f,o,g | bwd i,f,o,g]
    x_flat = x_ref[...].reshape(B * T, D)
    xg = (jnp.dot(x_flat, wih_ref[...], preferred_element_type=jnp.float32)
          + bih_ref[...])                       # (B*T, 8H), biases folded once
    xg = xg.reshape(B, T, 2 * H4)

    # ---- forward recurrence (the only recurrence actually needed) ----
    whh = whh_ref[...]                          # (H, 4H), gate order i,f,o,g
    h = jnp.zeros((B, H), jnp.float32)
    c = jnp.zeros((B, H), jnp.float32)
    for t in range(T):                          # static full unroll (T small/fixed)
        gates = xg[:, t, :H4] + jnp.dot(h, whh, preferred_element_type=jnp.float32)
        sig = jax.nn.sigmoid(gates[:, :H3])     # [i | f | o] in one EUP slab
        g = jnp.tanh(gates[:, H3:])             # [g]
        c = sig[:, H:H2] * c + sig[:, :H] * g
        h = sig[:, H2:H3] * jnp.tanh(c)

    # ---- backward direction: only its state at time index T-1 is consumed,
    #      which is its FIRST step from zero state -> no recurrence, no matmul.
    gb = xg[:, T - 1, H4:]                      # (B, 4H) pre-activations
    sigb = jax.nn.sigmoid(gb[:, :H3])
    gbg = jnp.tanh(gb[:, H3:])
    cb = sigb[:, :H] * gbg                      # f * c0 = 0 since c0 = 0
    hb = sigb[:, H2:H3] * jnp.tanh(cb)

    rep = jnp.concatenate([h, hb], axis=-1)     # (B, 2H) == text_enc[:, -1, :]

    # ---- MLP head + log_softmax (dropout = identity in eval mode) ----
    h1 = jnp.maximum(
        jnp.dot(rep, w1_ref[...], preferred_element_type=jnp.float32) + b1_ref[...], 0.0)
    h2 = jnp.maximum(
        jnp.dot(h1, w2_ref[...], preferred_element_type=jnp.float32) + b2_ref[...], 0.0)
    logits = jnp.dot(h2, w3_ref[...], preferred_element_type=jnp.float32)
    z = logits - jnp.max(logits, axis=-1, keepdims=True)
    out_ref[...] = z - jnp.log(jnp.sum(jnp.exp(z), axis=-1, keepdims=True))


# --------------------------------------------------------------------------
# Parameter packing (PyTorch layout -> kernel layout), done once
# --------------------------------------------------------------------------
def pack_kernel_params(params):
    H = params["whh_f"].shape[0]

    def reorder(w):
        # columns [i, f, g, o] (PyTorch) -> [i, f, o, g] (kernel)
        return jnp.concatenate([w[:, :2 * H], w[:, 3 * H:], w[:, 2 * H:3 * H]], axis=1)

    return {
        "embedding": params["embedding"],
        # (D, 8H): forward gates then backward gates, each re-ordered
        "wih_all": jnp.concatenate(
            [reorder(params["wih_f"]), reorder(params["wih_b"])], axis=1),
        # (1, 8H): combined b_ih + b_hh per direction, re-ordered
        "b_all": jnp.concatenate(
            [reorder(params["b_f"]), reorder(params["b_b"])], axis=1),
        "whh_f": reorder(params["whh_f"]),      # (H, 4H)
        "w1": params["w1"], "b1": params["b1"],
        "w2": params["w2"], "b2": params["b2"],
        "w3": params["w3"],
    }


# --------------------------------------------------------------------------
# Full forward
# --------------------------------------------------------------------------
def lstm_classifier_forward(text_ids, kp):
    # embedding lookup (glue; in-kernel gather only pays off for large vocabs)
    emb = jnp.take(kp["embedding"], text_ids, axis=0).astype(jnp.float32)  # (B, T, D)
    B = emb.shape[0]
    d_out = kp["w3"].shape[1]
    return pl.pallas_call(
        lstm_classifier_kernel,
        out_shape=jax.ShapeDtypeStruct((B, d_out), jnp.float32),
        in_specs=[_vmem_spec()] * 9,
        out_specs=_vmem_spec(),
    )(emb, kp["wih_all"], kp["b_all"], kp["whh_f"],
      kp["w1"], kp["b1"], kp["w2"], kp["b2"], kp["w3"])


# --------------------------------------------------------------------------
# Pure-JAX reference (mirrors PyTorch layout / full bidirectional LSTM)
# --------------------------------------------------------------------------
def reference_forward(text_ids, params):
    emb = jnp.take(params["embedding"], text_ids, axis=0)   # (B, T, D)
    B, T, D = emb.shape
    H = params["whh_f"].shape[0]

    def run_dir(wih, whh, b, reverse):
        h = jnp.zeros((B, H), jnp.float32)
        c = jnp.zeros((B, H), jnp.float32)
        outs = []
        ts = range(T - 1, -1, -1) if reverse else range(T)
        for t in ts:
            gates = emb[:, t, :] @ wih + h @ whh + b
            i = jax.nn.sigmoid(gates[:, 0 * H:1 * H])
            f = jax.nn.sigmoid(gates[:, 1 * H:2 * H])
            g = jnp.tanh(gates[:, 2 * H:3 * H])
            o = jax.nn.sigmoid(gates[:, 3 * H:4 * H])
            c = f * c + i * g
            h = o * jnp.tanh(c)
            outs.append((t, h))
        out = [None] * T
        for t, h_t in outs:
            out[t] = h_t
        return jnp.stack(out, axis=1)  # (B, T, H)

    of = run_dir(params["wih_f"], params["whh_f"], params["b_f"], False)
    ob = run_dir(params["wih_b"], params["whh_b"], params["b_b"], True)
    enc = jnp.concatenate([of, ob], axis=-1)
    repr_ = enc[:, -1, :]
    h1 = jnp.maximum(repr_ @ params["w1"] + params["b1"], 0.0)
    h2 = jnp.maximum(h1 @ params["w2"] + params["b2"], 0.0)
    logits = h2 @ params["w3"]
    return jax.nn.log_softmax(logits, axis=-1)


# --------------------------------------------------------------------------
# Deterministic parameter init (PyTorch-style layout, gate order i,f,g,o)
# --------------------------------------------------------------------------
def init_params(key, vocab, d_in, d_hidden, d_out):
    ks = jax.random.split(key, 16)
    k_lstm = 1.0 / jnp.sqrt(d_hidden)
    d_rep = 2 * d_hidden
    k_lin = 1.0 / jnp.sqrt(d_rep)

    def u(k, shape, scale):
        return jax.random.uniform(k, shape, jnp.float32, -scale, scale)

    return {
        "embedding": jax.random.normal(ks[0], (vocab, d_in), jnp.float32),
        # LSTM weights, stored (in, 4H); biases stored as (1, 4H) = b_ih + b_hh
        "wih_f": u(ks[1], (d_in, 4 * d_hidden), k_lstm),
        "whh_f": u(ks[2], (d_hidden, 4 * d_hidden), k_lstm),
        "b_f": u(ks[3], (1, 4 * d_hidden), k_lstm) + u(ks[4], (1, 4 * d_hidden), k_lstm),
        "wih_b": u(ks[5], (d_in, 4 * d_hidden), k_lstm),
        "whh_b": u(ks[6], (d_hidden, 4 * d_hidden), k_lstm),
        "b_b": u(ks[7], (1, 4 * d_hidden), k_lstm) + u(ks[8], (1, 4 * d_hidden), k_lstm),
        # MLP head, stored (in, out)
        "w1": u(ks[9], (d_rep, d_rep), k_lin),
        "b1": u(ks[10], (1, d_rep), k_lin),
        "w2": u(ks[11], (d_rep, d_rep), k_lin),
        "b2": u(ks[12], (1, d_rep), k_lin),
        "w3": u(ks[13], (d_rep, d_out), k_lin),
    }


if __name__ == "__main__":
    B, T = 2, 8
    vocab, d_in, d_hidden, d_out = 50, 32, 32, 4

    key = jax.random.PRNGKey(0)
    k_params, k_text = jax.random.split(key)
    params = init_params(k_params, vocab, d_in, d_hidden, d_out)
    kernel_params = pack_kernel_params(params)
    text_ids = jax.random.randint(k_text, (B, T), 0, vocab, dtype=jnp.int32)

    out = jax.block_until_ready(lstm_classifier_forward(text_ids, kernel_params))
    ref = jax.block_until_ready(reference_forward(text_ids, params))

    assert out.shape == (B, d_out), out.shape
    assert jnp.allclose(out, ref, atol=1e-4, rtol=1e-4), (out, ref)
    print("KERNEL_OK")
</pallas_src>

<mosaic_0001>
module attributes {stable_mosaic.version = 11 : i64} {
  func.func @lstm_classifier_kernel(%arg0: memref<2x8x32xf32, #tpu.memory_space<vmem>>, %arg1: memref<32x256xf32, #tpu.memory_space<vmem>>, %arg2: memref<1x256xf32, #tpu.memory_space<vmem>>, %arg3: memref<32x128xf32, #tpu.memory_space<vmem>>, %arg4: memref<64x64xf32, #tpu.memory_space<vmem>>, %arg5: memref<1x64xf32, #tpu.memory_space<vmem>>, %arg6: memref<64x64xf32, #tpu.memory_space<vmem>>, %arg7: memref<1x64xf32, #tpu.memory_space<vmem>>, %arg8: memref<64x4xf32, #tpu.memory_space<vmem>>, %arg9: memref<2x4xf32, #tpu.memory_space<vmem>>) attributes {dimension_semantics = [], scalar_prefetch = 0 : i64, scratch_operands = 0 : i64, tpu.core_type = #tpu.core_type<tc>} {
    %c0 = arith.constant 0 : index
    %c0_0 = arith.constant 0 : index
    %c0_1 = arith.constant 0 : index
    %0 = vector.load %arg0[%c0, %c0_0, %c0_1] : memref<2x8x32xf32, #tpu.memory_space<vmem>>, vector<2x8x32xf32>
    %1 = vector.shape_cast %0 : vector<2x8x32xf32> to vector<16x32xf32>
    %c0_2 = arith.constant 0 : index
    %c0_3 = arith.constant 0 : index
    %2 = vector.load %arg1[%c0_2, %c0_3] : memref<32x256xf32, #tpu.memory_space<vmem>>, vector<32x256xf32>
    %cst = arith.constant dense<0.000000e+00> : vector<16x256xf32>
    %3 = tpu.matmul %1, %2, %cst {dimension_numbers = #tpu.dot_dimension_numbers<[1], [0], [0], [1], [0, 0, 1, 1], [], []>} : vector<16x32xf32>, vector<32x256xf32>, vector<16x256xf32> -> vector<16x256xf32>
    %c0_4 = arith.constant 0 : index
    %c0_5 = arith.constant 0 : index
    %4 = vector.load %arg2[%c0_4, %c0_5] : memref<1x256xf32, #tpu.memory_space<vmem>>, vector<1x256xf32>
    %5 = vector.broadcast %4 : vector<1x256xf32> to vector<16x256xf32>
    %6 = arith.addf %3, %5 : vector<16x256xf32>
    %7 = vector.shape_cast %6 : vector<16x256xf32> to vector<2x8x256xf32>
    %c0_6 = arith.constant 0 : index
    %c0_7 = arith.constant 0 : index
    %8 = vector.load %arg3[%c0_6, %c0_7] : memref<32x128xf32, #tpu.memory_space<vmem>>, vector<32x128xf32>
    %cst_8 = arith.constant 0.000000e+00 : f32
    %9 = vector.broadcast %cst_8 : f32 to vector<2x32xf32>
    %cst_9 = arith.constant 0.000000e+00 : f32
    %10 = vector.broadcast %cst_9 : f32 to vector<2x32xf32>
    %11 = vector.extract_strided_slice %7 {offsets = [0, 0, 0], sizes = [2, 1, 128], strides = [1, 1, 1]} : vector<2x8x256xf32> to vector<2x1x128xf32>
    %12 = vector.shape_cast %11 : vector<2x1x128xf32> to vector<2x128xf32>
    %cst_10 = arith.constant dense<0.000000e+00> : vector<2x128xf32>
    %13 = tpu.matmul %9, %8, %cst_10 {dimension_numbers = #tpu.dot_dimension_numbers<[1], [0], [0], [1], [0, 0, 1, 1], [], []>} : vector<2x32xf32>, vector<32x128xf32>, vector<2x128xf32> -> vector<2x128xf32>
    %14 = arith.addf %12, %13 : vector<2x128xf32>
    %15 = vector.extract_strided_slice %14 {offsets = [0, 0], sizes = [2, 96], strides = [1, 1]} : vector<2x128xf32> to vector<2x96xf32>
    %16 = arith.negf %15 : vector<2x96xf32>
    %17 = math.exp %16 : vector<2x96xf32>
    %cst_11 = arith.constant 1.000000e+00 : f32
    %18 = vector.broadcast %cst_11 : f32 to vector<2x96xf32>
    %19 = arith.addf %18, %17 : vector<2x96xf32>
    %20 = arith.divf %18, %19 : vector<2x96xf32>
    %21 = vector.extract_strided_slice %14 {offsets = [0, 96], sizes = [2, 32], strides = [1, 1]} : vector<2x128xf32> to vector<2x32xf32>
    %22 = math.tanh %21 : vector<2x32xf32>
    %23 = vector.extract_strided_slice %20 {offsets = [0, 32], sizes = [2, 32], strides = [1, 1]} : vector<2x96xf32> to vector<2x32xf32>
    %24 = arith.mulf %23, %10 : vector<2x32xf32>
    %25 = vector.extract_strided_slice %20 {offsets = [0, 0], sizes = [2, 32], strides = [1, 1]} : vector<2x96xf32> to vector<2x32xf32>
    %26 = arith.mulf %25, %22 : vector<2x32xf32>
    %27 = arith.addf %24, %26 : vector<2x32xf32>
    %28 = vector.extract_strided_slice %20 {offsets = [0, 64], sizes = [2, 32], strides = [1, 1]} : vector<2x96xf32> to vector<2x32xf32>
    %29 = math.tanh %27 : vector<2x32xf32>
    %30 = arith.mulf %28, %29 : vector<2x32xf32>
    %31 = vector.extract_strided_slice %7 {offsets = [0, 1, 0], sizes = [2, 1, 128], strides = [1, 1, 1]} : vector<2x8x256xf32> to vector<2x1x128xf32>
    %32 = vector.shape_cast %31 : vector<2x1x128xf32> to vector<2x128xf32>
    %cst_12 = arith.constant dense<0.000000e+00> : vector<2x128xf32>
    %33 = tpu.matmul %30, %8, %cst_12 {dimension_numbers = #tpu.dot_dimension_numbers<[1], [0], [0], [1], [0, 0, 1, 1], [], []>} : vector<2x32xf32>, vector<32x128xf32>, vector<2x128xf32> -> vector<2x128xf32>
    %34 = arith.addf %32, %33 : vector<2x128xf32>
    %35 = vector.extract_strided_slice %34 {offsets = [0, 0], sizes = [2, 96], strides = [1, 1]} : vector<2x128xf32> to vector<2x96xf32>
    %36 = arith.negf %35 : vector<2x96xf32>
    %37 = math.exp %36 : vector<2x96xf32>
    %cst_13 = arith.constant 1.000000e+00 : f32
    %38 = vector.broadcast %cst_13 : f32 to vector<2x96xf32>
    %39 = arith.addf %38, %37 : vector<2x96xf32>
    %40 = arith.divf %38, %39 : vector<2x96xf32>
    %41 = vector.extract_strided_slice %34 {offsets = [0, 96], sizes = [2, 32], strides = [1, 1]} : vector<2x128xf32> to vector<2x32xf32>
    %42 = math.tanh %41 : vector<2x32xf32>
    %43 = vector.extract_strided_slice %40 {offsets = [0, 32], sizes = [2, 32], strides = [1, 1]} : vector<2x96xf32> to vector<2x32xf32>
    %44 = arith.mulf %43, %27 : vector<2x32xf32>
    %45 = vector.extract_strided_slice %40 {offsets = [0, 0], sizes = [2, 32], strides = [1, 1]} : vector<2x96xf32> to vector<2x32xf32>
    %46 = arith.mulf %45, %42 : vector<2x32xf32>
    %47 = arith.addf %44, %46 : vector<2x32xf32>
    %48 = vector.extract_strided_slice %40 {offsets = [0, 64], sizes = [2, 32], strides = [1, 1]} : vector<2x96xf32> to vector<2x32xf32>
    %49 = math.tanh %47 : vector<2x32xf32>
    %50 = arith.mulf %48, %49 : vector<2x32xf32>
    %51 = vector.extract_strided_slice %7 {offsets = [0, 2, 0], sizes = [2, 1, 128], strides = [1, 1, 1]} : vector<2x8x256xf32> to vector<2x1x128xf32>
    %52 = vector.shape_cast %51 : vector<2x1x128xf32> to vector<2x128xf32>
    %cst_14 = arith.constant dense<0.000000e+00> : vector<2x128xf32>
    %53 = tpu.matmul %50, %8, %cst_14 {dimension_numbers = #tpu.dot_dimension_numbers<[1], [0], [0], [1], [0, 0, 1, 1], [], []>} : vector<2x32xf32>, vector<32x128xf32>, vector<2x128xf32> -> vector<2x128xf32>
    %54 = arith.addf %52, %53 : vector<2x128xf32>
    %55 = vector.extract_strided_slice %54 {offsets = [0, 0], sizes = [2, 96], strides = [1, 1]} : vector<2x128xf32> to vector<2x96xf32>
    %56 = arith.negf %55 : vector<2x96xf32>
    %57 = math.exp %56 : vector<2x96xf32>
    %cst_15 = arith.constant 1.000000e+00 : f32
    %58 = vector.broadcast %cst_15 : f32 to vector<2x96xf32>
    %59 = arith.addf %58, %57 : vector<2x96xf32>
    %60 = arith.divf %58, %59 : vector<2x96xf32>
    %61 = vector.extract_strided_slice %54 {offsets = [0, 96], sizes = [2, 32], strides = [1, 1]} : vector<2x128xf32> to vector<2x32xf32>
    %62 = math.tanh %61 : vector<2x32xf32>
    %63 = vector.extract_strided_slice %60 {offsets = [0, 32], sizes = [2, 32], strides = [1, 1]} : vector<2x96xf32> to vector<2x32xf32>
    %64 = arith.mulf %63, %47 : vector<2x32xf32>
    %65 = vector.extract_strided_slice %60 {offsets = [0, 0], sizes = [2, 32], strides = [1, 1]} : vector<2x96xf32> to vector<2x32xf32>
    %66 = arith.mulf %65, %62 : vector<2x32xf32>
    %67 = arith.addf %64, %66 : vector<2x32xf32>
    %68 = vector.extract_strided_slice %60 {offsets = [0, 64], sizes = [2, 32], strides = [1, 1]} : vector<2x96xf32> to vector<2x32xf32>
    %69 = math.tanh %67 : vector<2x32xf32>
    %70 = arith.mulf %68, %69 : vector<2x32xf32>
    %71 = vector.extract_strided_slice %7 {offsets = [0, 3, 0], sizes = [2, 1, 128], strides = [1, 1, 1]} : vector<2x8x256xf32> to vector<2x1x128xf32>
    %72 = vector.shape_cast %71 : vector<2x1x128xf32> to vector<2x128xf32>
    %cst_16 = arith.constant dense<0.000000e+00> : vector<2x128xf32>
    %73 = tpu.matmul %70, %8, %cst_16 {dimension_numbers = #tpu.dot_dimension_numbers<[1], [0], [0], [1], [0, 0, 1, 1], [], []>} : vector<2x32xf32>, vector<32x128xf32>, vector<2x128xf32> -> vector<2x128xf32>
    %74 = arith.addf %72, %73 : vector<2x128xf32>
    %75 = vector.extract_strided_slice %74 {offsets = [0, 0], sizes = [2, 96], strides = [1, 1]} : vector<2x128xf32> to vector<2x96xf32>
    %76 = arith.negf %75 : vector<2x96xf32>
    %77 = math.exp %76 : vector<2x96xf32>
    %cst_17 = arith.constant 1.000000e+00 : f32
    %78 = vector.broadcast %cst_17 : f32 to vector<2x96xf32>
    %79 = arith.addf %78, %77 : vector<2x96xf32>
    %80 = arith.divf %78, %79 : vector<2x96xf32>
    %81 = vector.extract_strided_slice %74 {offsets = [0, 96], sizes = [2, 32], strides = [1, 1]} : vector<2x128xf32> to vector<2x32xf32>
    %82 = math.tanh %81 : vector<2x32xf32>
    %83 = vector.extract_strided_slice %80 {offsets = [0, 32], sizes = [2, 32], strides = [1, 1]} : vector<2x96xf32> to vector<2x32xf32>
    %84 = arith.mulf %83, %67 : vector<2x32xf32>
    %85 = vector.extract_strided_slice %80 {offsets = [0, 0], sizes = [2, 32], strides = [1, 1]} : vector<2x96xf32> to vector<2x32xf32>
    %86 = arith.mulf %85, %82 : vector<2x32xf32>
    %87 = arith.addf %84, %86 : vector<2x32xf32>
    %88 = vector.extract_strided_slice %80 {offsets = [0, 64], sizes = [2, 32], strides = [1, 1]} : vector<2x96xf32> to vector<2x32xf32>
    %89 = math.tanh %87 : vector<2x32xf32>
    %90 = arith.mulf %88, %89 : vector<2x32xf32>
    %91 = vector.extract_strided_slice %7 {offsets = [0, 4, 0], sizes = [2, 1, 128], strides = [1, 1, 1]} : vector<2x8x256xf32> to vector<2x1x128xf32>
    %92 = vector.shape_cast %91 : vector<2x1x128xf32> to vector<2x128xf32>
    %cst_18 = arith.constant dense<0.000000e+00> : vector<2x128xf32>
    %93 = tpu.matmul %90, %8, %cst_18 {dimension_numbers = #tpu.dot_dimension_numbers<[1], [0], [0], [1], [0, 0, 1, 1], [], []>} : vector<2x32xf32>, vector<32x128xf32>, vector<2x128xf32> -> vector<2x128xf32>
    %94 = arith.addf %92, %93 : vector<2x128xf32>
    %95 = vector.extract_strided_slice %94 {offsets = [0, 0], sizes = [2, 96], strides = [1, 1]} : vector<2x128xf32> to vector<2x96xf32>
    %96 = arith.negf %95 : vector<2x96xf32>
    %97 = math.exp %96 : vector<2x96xf32>
    %cst_19 = arith.constant 1.000000e+00 : f32
    %98 = vector.broadcast %cst_19 : f32 to vector<2x96xf32>
    %99 = arith.addf %98, %97 : vector<2x96xf32>
    %100 = arith.divf %98, %99 : vector<2x96xf32>
    %101 = vector.extract_strided_slice %94 {offsets = [0, 96], sizes = [2, 32], strides = [1, 1]} : vector<2x128xf32> to vector<2x32xf32>
    %102 = math.tanh %101 : vector<2x32xf32>
    %103 = vector.extract_strided_slice %100 {offsets = [0, 32], sizes = [2, 32], strides = [1, 1]} : vector<2x96xf32> to vector<2x32xf32>
    %104 = arith.mulf %103, %87 : vector<2x32xf32>
    %105 = vector.extract_strided_slice %100 {offsets = [0, 0], sizes = [2, 32], strides = [1, 1]} : vector<2x96xf32> to vector<2x32xf32>
    %106 = arith.mulf %105, %102 : vector<2x32xf32>
    %107 = arith.addf %104, %106 : vector<2x32xf32>
    %108 = vector.extract_strided_slice %100 {offsets = [0, 64], sizes = [2, 32], strides = [1, 1]} : vector<2x96xf32> to vector<2x32xf32>
    %109 = math.tanh %107 : vector<2x32xf32>
    %110 = arith.mulf %108, %109 : vector<2x32xf32>
    %111 = vector.extract_strided_slice %7 {offsets = [0, 5, 0], sizes = [2, 1, 128], strides = [1, 1, 1]} : vector<2x8x256xf32> to vector<2x1x128xf32>
    %112 = vector.shape_cast %111 : vector<2x1x128xf32> to vector<2x128xf32>
    %cst_20 = arith.constant dense<0.000000e+00> : vector<2x128xf32>
    %113 = tpu.matmul %110, %8, %cst_20 {dimension_numbers = #tpu.dot_dimension_numbers<[1], [0], [0], [1], [0, 0, 1, 1], [], []>} : vector<2x32xf32>, vector<32x128xf32>, vector<2x128xf32> -> vector<2x128xf32>
    %114 = arith.addf %112, %113 : vector<2x128xf32>
    %115 = vector.extract_strided_slice %114 {offsets = [0, 0], sizes = [2, 96], strides = [1, 1]} : vector<2x128xf32> to vector<2x96xf32>
    %116 = arith.negf %115 : vector<2x96xf32>
    %117 = math.exp %116 : vector<2x96xf32>
    %cst_21 = arith.constant 1.000000e+00 : f32
    %118 = vector.broadcast %cst_21 : f32 to vector<2x96xf32>
    %119 = arith.addf %118, %117 : vector<2x96xf32>
    %120 = arith.divf %118, %119 : vector<2x96xf32>
    %121 = vector.extract_strided_slice %114 {offsets = [0, 96], sizes = [2, 32], strides = [1, 1]} : vector<2x128xf32> to vector<2x32xf32>
    %122 = math.tanh %121 : vector<2x32xf32>
    %123 = vector.extract_strided_slice %120 {offsets = [0, 32], sizes = [2, 32], strides = [1, 1]} : vector<2x96xf32> to vector<2x32xf32>
    %124 = arith.mulf %123, %107 : vector<2x32xf32>
    %125 = vector.extract_strided_slice %120 {offsets = [0, 0], sizes = [2, 32], strides = [1, 1]} : vector<2x96xf32> to vector<2x32xf32>
    %126 = arith.mulf %125, %122 : vector<2x32xf32>
    %127 = arith.addf %124, %126 : vector<2x32xf32>
    %128 = vector.extract_strided_slice %120 {offsets = [0, 64], sizes = [2, 32], strides = [1, 1]} : vector<2x96xf32> to vector<2x32xf32>
    %129 = math.tanh %127 : vector<2x32xf32>
    %130 = arith.mulf %128, %129 : vector<2x32xf32>
    %131 = vector.extract_strided_slice %7 {offsets = [0, 6, 0], sizes = [2, 1, 128], strides = [1, 1, 1]} : vector<2x8x256xf32> to vector<2x1x128xf32>
    %132 = vector.shape_cast %131 : vector<2x1x128xf32> to vector<2x128xf32>
    %cst_22 = arith.constant dense<0.000000e+00> : vector<2x128xf32>
    %133 = tpu.matmul %130, %8, %cst_22 {dimension_numbers = #tpu.dot_dimension_numbers<[1], [0], [0], [1], [0, 0, 1, 1], [], []>} : vector<2x32xf32>, vector<32x128xf32>, vector<2x128xf32> -> vector<2x128xf32>
    %134 = arith.addf %132, %133 : vector<2x128xf32>
    %135 = vector.extract_strided_slice %134 {offsets = [0, 0], sizes = [2, 96], strides = [1, 1]} : vector<2x128xf32> to vector<2x96xf32>
    %136 = arith.negf %135 : vector<2x96xf32>
    %137 = math.exp %136 : vector<2x96xf32>
    %cst_23 = arith.constant 1.000000e+00 : f32
    %138 = vector.broadcast %cst_23 : f32 to vector<2x96xf32>
    %139 = arith.addf %138, %137 : vector<2x96xf32>
    %140 = arith.divf %138, %139 : vector<2x96xf32>
    %141 = vector.extract_strided_slice %134 {offsets = [0, 96], sizes = [2, 32], strides = [1, 1]} : vector<2x128xf32> to vector<2x32xf32>
    %142 = math.tanh %141 : vector<2x32xf32>
    %143 = vector.extract_strided_slice %140 {offsets = [0, 32], sizes = [2, 32], strides = [1, 1]} : vector<2x96xf32> to vector<2x32xf32>
    %144 = arith.mulf %143, %127 : vector<2x32xf32>
    %145 = vector.extract_strided_slice %140 {offsets = [0, 0], sizes = [2, 32], strides = [1, 1]} : vector<2x96xf32> to vector<2x32xf32>
    %146 = arith.mulf %145, %142 : vector<2x32xf32>
    %147 = arith.addf %144, %146 : vector<2x32xf32>
    %148 = vector.extract_strided_slice %140 {offsets = [0, 64], sizes = [2, 32], strides = [1, 1]} : vector<2x96xf32> to vector<2x32xf32>
    %149 = math.tanh %147 : vector<2x32xf32>
    %150 = arith.mulf %148, %149 : vector<2x32xf32>
    %151 = vector.extract_strided_slice %7 {offsets = [0, 7, 0], sizes = [2, 1, 128], strides = [1, 1, 1]} : vector<2x8x256xf32> to vector<2x1x128xf32>
    %152 = vector.shape_cast %151 : vector<2x1x128xf32> to vector<2x128xf32>
    %cst_24 = arith.constant dense<0.000000e+00> : vector<2x128xf32>
    %153 = tpu.matmul %150, %8, %cst_24 {dimension_numbers = #tpu.dot_dimension_numbers<[1], [0], [0], [1], [0, 0, 1, 1], [], []>} : vector<2x32xf32>, vector<32x128xf32>, vector<2x128xf32> -> vector<2x128xf32>
    %154 = arith.addf %152, %153 : vector<2x128xf32>
    %155 = vector.extract_strided_slice %154 {offsets = [0, 0], sizes = [2, 96], strides = [1, 1]} : vector<2x128xf32> to vector<2x96xf32>
    %156 = arith.negf %155 : vector<2x96xf32>
    %157 = math.exp %156 : vector<2x96xf32>
    %cst_25 = arith.constant 1.000000e+00 : f32
    %158 = vector.broadcast %cst_25 : f32 to vector<2x96xf32>
    %159 = arith.addf %158, %157 : vector<2x96xf32>
    %160 = arith.divf %158, %159 : vector<2x96xf32>
    %161 = vector.extract_strided_slice %154 {offsets = [0, 96], sizes = [2, 32], strides = [1, 1]} : vector<2x128xf32> to vector<2x32xf32>
    %162 = math.tanh %161 : vector<2x32xf32>
    %163 = vector.extract_strided_slice %160 {offsets = [0, 32], sizes = [2, 32], strides = [1, 1]} : vector<2x96xf32> to vector<2x32xf32>
    %164 = arith.mulf %163, %147 : vector<2x32xf32>
    %165 = vector.extract_strided_slice %160 {offsets = [0, 0], sizes = [2, 32], strides = [1, 1]} : vector<2x96xf32> to vector<2x32xf32>
    %166 = arith.mulf %165, %162 : vector<2x32xf32>
    %167 = arith.addf %164, %166 : vector<2x32xf32>
    %168 = vector.extract_strided_slice %160 {offsets = [0, 64], sizes = [2, 32], strides = [1, 1]} : vector<2x96xf32> to vector<2x32xf32>
    %169 = math.tanh %167 : vector<2x32xf32>
    %170 = arith.mulf %168, %169 : vector<2x32xf32>
    %171 = vector.extract_strided_slice %7 {offsets = [0, 7, 128], sizes = [2, 1, 128], strides = [1, 1, 1]} : vector<2x8x256xf32> to vector<2x1x128xf32>
    %172 = vector.shape_cast %171 : vector<2x1x128xf32> to vector<2x128xf32>
    %173 = vector.extract_strided_slice %172 {offsets = [0, 0], sizes = [2, 96], strides = [1, 1]} : vector<2x128xf32> to vector<2x96xf32>
    %174 = arith.negf %173 : vector<2x96xf32>
    %175 = math.exp %174 : vector<2x96xf32>
    %cst_26 = arith.constant 1.000000e+00 : f32
    %176 = vector.broadcast %cst_26 : f32 to vector<2x96xf32>
    %177 = arith.addf %176, %175 : vector<2x96xf32>
    %178 = arith.divf %176, %177 : vector<2x96xf32>
    %179 = vector.extract_strided_slice %172 {offsets = [0, 96], sizes = [2, 32], strides = [1, 1]} : vector<2x128xf32> to vector<2x32xf32>
    %180 = math.tanh %179 : vector<2x32xf32>
    %181 = vector.extract_strided_slice %178 {offsets = [0, 0], sizes = [2, 32], strides = [1, 1]} : vector<2x96xf32> to vector<2x32xf32>
    %182 = arith.mulf %181, %180 : vector<2x32xf32>
    %183 = vector.extract_strided_slice %178 {offsets = [0, 64], sizes = [2, 32], strides = [1, 1]} : vector<2x96xf32> to vector<2x32xf32>
    %184 = math.tanh %182 : vector<2x32xf32>
    %185 = arith.mulf %183, %184 : vector<2x32xf32>
    %186 = tpu.concatenate %170, %185 in 1 : vector<2x32xf32>, vector<2x32xf32> -> vector<2x64xf32>
    %c0_27 = arith.constant 0 : index
    %c0_28 = arith.constant 0 : index
    %187 = vector.load %arg4[%c0_27, %c0_28] : memref<64x64xf32, #tpu.memory_space<vmem>>, vector<64x64xf32>
    %cst_29 = arith.constant dense<0.000000e+00> : vector<2x64xf32>
    %188 = tpu.matmul %186, %187, %cst_29 {dimension_numbers = #tpu.dot_dimension_numbers<[1], [0], [0], [1], [0, 0, 1, 1], [], []>} : vector<2x64xf32>, vector<64x64xf32>, vector<2x64xf32> -> vector<2x64xf32>
    %c0_30 = arith.constant 0 : index
    %c0_31 = arith.constant 0 : index
    %189 = vector.load %arg5[%c0_30, %c0_31] : memref<1x64xf32, #tpu.memory_space<vmem>>, vector<1x64xf32>
    %190 = vector.broadcast %189 : vector<1x64xf32> to vector<2x64xf32>
    %191 = arith.addf %188, %190 : vector<2x64xf32>
    %cst_32 = arith.constant 0.000000e+00 : f32
    %192 = vector.broadcast %cst_32 : f32 to vector<2x64xf32>
    %193 = arith.maximumf %191, %192 : vector<2x64xf32>
    %c0_33 = arith.constant 0 : index
    %c0_34 = arith.constant 0 : index
    %194 = vector.load %arg6[%c0_33, %c0_34] : memref<64x64xf32, #tpu.memory_space<vmem>>, vector<64x64xf32>
    %cst_35 = arith.constant dense<0.000000e+00> : vector<2x64xf32>
    %195 = tpu.matmul %193, %194, %cst_35 {dimension_numbers = #tpu.dot_dimension_numbers<[1], [0], [0], [1], [0, 0, 1, 1], [], []>} : vector<2x64xf32>, vector<64x64xf32>, vector<2x64xf32> -> vector<2x64xf32>
    %c0_36 = arith.constant 0 : index
    %c0_37 = arith.constant 0 : index
    %196 = vector.load %arg7[%c0_36, %c0_37] : memref<1x64xf32, #tpu.memory_space<vmem>>, vector<1x64xf32>
    %197 = vector.broadcast %196 : vector<1x64xf32> to vector<2x64xf32>
    %198 = arith.addf %195, %197 : vector<2x64xf32>
    %cst_38 = arith.constant 0.000000e+00 : f32
    %199 = vector.broadcast %cst_38 : f32 to vector<2x64xf32>
    %200 = arith.maximumf %198, %199 : vector<2x64xf32>
    %c0_39 = arith.constant 0 : index
    %c0_40 = arith.constant 0 : index
    %201 = vector.load %arg8[%c0_39, %c0_40] : memref<64x4xf32, #tpu.memory_space<vmem>>, vector<64x4xf32>
    %cst_41 = arith.constant dense<0.000000e+00> : vector<2x4xf32>
    %202 = tpu.matmul %200, %201, %cst_41 {dimension_numbers = #tpu.dot_dimension_numbers<[1], [0], [0], [1], [0, 0, 1, 1], [], []>} : vector<2x64xf32>, vector<64x4xf32>, vector<2x4xf32> -> vector<2x4xf32>
    %cst_42 = arith.constant dense<0xFF800000> : vector<2xf32>
    %203 = vector.multi_reduction <maximumf>, %202, %cst_42 [1] : vector<2x4xf32> to vector<2xf32>
    %204 = vector.shape_cast %203 : vector<2xf32> to vector<2x1xf32>
    %205 = vector.broadcast %204 : vector<2x1xf32> to vector<2x4xf32>
    %206 = arith.subf %202, %205 : vector<2x4xf32>
    %207 = math.exp %206 : vector<2x4xf32>
    %cst_43 = arith.constant dense<0.000000e+00> : vector<2xf32>
    %208 = vector.multi_reduction <add>, %207, %cst_43 [1] : vector<2x4xf32> to vector<2xf32>
    %209 = vector.shape_cast %208 : vector<2xf32> to vector<2x1xf32>
    %210 = math.log %209 : vector<2x1xf32>
    %211 = vector.broadcast %210 : vector<2x1xf32> to vector<2x4xf32>
    %212 = arith.subf %206, %211 : vector<2x4xf32>
    %c0_44 = arith.constant 0 : index
    %c0_45 = arith.constant 0 : index
    %213 = vector.load %arg9[%c0_44, %c0_45] : memref<2x4xf32, #tpu.memory_space<vmem>>, vector<2x4xf32>
    tpu.vector_store %arg9[%c0_44, %c0_45], %212 {strides = array<i32>} : memref<2x4xf32, #tpu.memory_space<vmem>>, vector<2x4xf32>,
    return
  }
}

</mosaic_0001>

<bundles_post_ra>
// kernel: tpu_custom_call.1
= control target key start
LH: loop header
LB: loop body
LE: loop exit
PB: predicated region body
PF: predicated region fallthrough
CT: control target
= control target key end

     0   :  { %14 = vsyncpa [#allocation3], 0  ;;  %s2000_s0 = inlined_call_operand.hbm [shape: f32[2,8,32], index: 0, kind: input, shape index: {}]   ;;  %s2001_s1 = inlined_call_operand.vmem [shape: f32[32,256], index: 1, kind: input, shape index: {}]   ;;  %s2002_s2 = inlined_call_operand.vmem [shape: f32[1,256], index: 2, kind: input, shape index: {}]   ;;  %s2003_s3 = inlined_call_operand.hbm [shape: f32[32,128], index: 3, kind: input, shape index: {}]   ;;  %s2004_s4 = inlined_call_operand.hbm [shape: f32[64,64], index: 4, kind: input, shape index: {}]   ;;  %s2005_s5 = inlined_call_operand.vmem [shape: f32[1,64], index: 5, kind: input, shape index: {}]   ;;  %s2006_s6 = inlined_call_operand.hbm [shape: f32[64,64], index: 6, kind: input, shape index: {}]   ;;  %s2007_s7 = inlined_call_operand.vmem [shape: f32[1,64], index: 7, kind: input, shape index: {}]   ;;  %s2008_s8 = inlined_call_operand.vmem [shape: f32[64,4], index: 8, kind: input, shape index: {}]   ;;  %s2009_s9 = inlined_call_operand.hbm [shape: f32[2,4], index: 9, kind: output, shape index: {}]  }
   0x1   :  { %15 = vsyncpa [#allocation6], 0 }
   0x2   :  { %16 = vsyncpa [#allocation9], 0 }
   0x3   :  { %17 = vsyncpa [#allocation4], 0  ;;  %s39_s11 = sshll.u32 %s2003_s3, 4  ;;  %s1631_s12 = smov [#allocation5]   ;;  %s40_s11 = int_to_ptr.hbm [resolvable:$true] %s39_s11 }
   0x4   :  { %s41_s13 = sshll.u32 %s1631_s12, 4  ;;  %s22_s16 = sshll.u32 %s2000_s0, 4  ;;  %s42_s13 = int_to_ptr.vmem [resolvable:$true] %s41_s13  ;;  %s23_s16 = int_to_ptr.hbm [resolvable:$true] %s22_s16 }
   0x5   :  { %s1632_s17 = smov 128   ;;  %s1633_s18 = smov 8  }
   0x6   :  { %47 = dma.hbm_to_vmem [thread:$0]  %s40_s11, 512, %s42_s13, [#allocation6], %s1632_s17, %s1632_s17, %s1633_s18  }
   0x7   :  { %s1634_s19 = smov [#allocation2]   ;;  %s52_s23 = sshll.u32 %s2004_s4, 4  ;;  %s53_s23 = int_to_ptr.hbm [resolvable:$true] %s52_s23 }
   0x8   :  { %s24_s20 = sshll.u32 %s1634_s19, 4  ;;  %s67_s25 = sshll.u32 %s2006_s6, 4  ;;  %s25_s20 = int_to_ptr.vmem [resolvable:$true] %s24_s20  ;;  %s68_s25 = int_to_ptr.hbm [resolvable:$true] %s67_s25 }
   0x9   :  { %30 = dma.hbm_to_vmem [thread:$0]  %s23_s16, 256, %s25_s20, [#allocation3], %s1632_s17, %s1632_s17, %s1633_s18  }
   0xa   :  { %s1635_s26 = smov [#allocation7]   ;;  %s1636_s0 = smov [#allocation8]  }
   0xb   :  { %s54_s27 = sshll.u32 %s1635_s26, 4  ;;  %s69_s28 = sshll.u32 %s1636_s0, 4  ;;  %s55_s27 = int_to_ptr.vmem [resolvable:$true] %s54_s27  ;;  %s70_s28 = int_to_ptr.vmem [resolvable:$true] %s69_s28 }
   0xc   :  { %60 = dma.hbm_to_vmem [thread:$0]  %s53_s23, 1024, %s55_s27, [#allocation6], %s1632_s17, %s1632_s17, %s1633_s18  }
   0xd   :  { %75 = dma.hbm_to_vmem [thread:$0]  %s68_s25, 1024, %s70_s28, [#allocation9], %s1632_s17, %s1632_s17, %s1633_s18  }
   0xe   :  { %1623 = dma.done.wait [#allocation3], 256  }
   0xf   :  { %1624 = vsyncadd [#allocation3], 4294967040 }
  0x10   :  { %1625 = dma.done.wait [#allocation6], 1536  }
  0x11   :  { %1626 = vsyncadd [#allocation6], 4294965760 }
  0x12   :  { %1627 = dma.done.wait [#allocation9], 1024  }
  0x13   :  { %1628 = vsyncadd [#allocation9], 4294966272  ;;  %v104_v0 = vld [vmem:[%s2001_s1 + $0x30] sm:$0xff]  ;;  %v1707_v1 = vld [vmem:[#allocation5 + $0x18] sm:$0xff]  ;;  %vm112_vm0 = vcmask 261120   ;;  %v1637_v10 = vmov 0.0  }
  0x14   :  { %v102_v2 = vld [vmem:[%s2001_s1 + $0x20] sm:$0xff]  ;;  %1338 = vmatpush.msra.mxu3 %v104_v0  ;;  %184 = vmatpush.msra.mxu2 %v1707_v1  ;;  %v100_v4 = vld [vmem:[%s2001_s1 + $0x10] sm:$0xff]  ;;  %v1718_v5 = vld [vmem:[#allocation5 + $0x8] sm:$0xff]  ;;  %s1638_s16 = smov 32   ;;  %vm275_vm9 = vcmask 1041409   ;;  %s1294_s20 = sshll.u32 %s2009_s9, 4  ;;  %s1295_s20 = int_to_ptr.hbm [resolvable:$true] %s1294_s20 }
  0x15   :  { %v1713_v3 = vld [vmem:[#allocation5 + $0x10] sm:$0xff]  ;;  %131 = vmatpush.msra.mxu0 %v104_v0  ;;  %v1724_v7 = vld [vmem:[#allocation5] sm:$0xff]  ;;  %v1727_v8 = vld [vmem:[#allocation2 + $0x8] sm:$0xff] }
  0x16   :  { %1339 = vmatpush.msra.mxu3 %v102_v2  ;;  %185 = vmatpush.msra.mxu2 %v1713_v3  ;;  %v98_v6 = vld [vmem:[%s2001_s1] sm:$0xff] }
  0x17   :  { %132 = vmatpush.msra.mxu0 %v102_v2  ;;  %v1730_v9 = vld [vmem:[#allocation2] sm:$0xff] }
  0x18   :  { %1340 = vmatpush.msra.mxu3 %v100_v4  ;;  %186 = vmatpush.msra.mxu2 %v1718_v5  ;;  %v1759_v11 = vld [vmem:[%s2002_s2] sm:$0x3]  ;;  %s1639_s2 = smov 64  }
  0x19   :  { %133 = vmatpush.msra.mxu0 %v100_v4  ;;  %v108_v12 = vperm.slane %v1759_v11, 0 }
  0x1a   :  { %1341 = vmatpush.msra.mxu3 %v98_v6  ;;  %187 = vmatpush.msra.mxu2 %v1724_v7 }
  0x1b   :  { %1307 = vmatmul.msk.f32.vlgmr.msra.gmra.mxu3 %vm112_vm0, %v1727_v8  ;;  %188 = vmatmul.f32.vlgmr.msra.gmra.mxu2 %v1637_v10 }
  0x1c   :  { %134 = vmatpush.msra.mxu0 %v98_v6  ;;  %293 = vmatpush.msrb.mxu3 %v1707_v1 }
  0x1d   :  { %1306 = vmatmul.msk.f32.vlgmr.msra.gmra.mxu0 %vm112_vm0, %v1730_v9  ;;  %407 = vmatpush.msrb.mxu2 %v1707_v1 }
  0x1e   :  { %294 = vmatpush.msrb.mxu3 %v1713_v3  ;;  %639 = vmatpush.msrb.mxu0 %v1707_v1 }
  0x1f   :  { %408 = vmatpush.msrb.mxu2 %v1713_v3 }
  0x20   :  { %295 = vmatpush.msrb.mxu3 %v1718_v5  ;;  %640 = vmatpush.msrb.mxu0 %v1713_v3 }
  0x21   :  { %409 = vmatpush.msrb.mxu2 %v1718_v5 }
  0x22   :  { %296 = vmatpush.msrb.mxu3 %v1724_v7  ;;  %641 = vmatpush.msrb.mxu0 %v1718_v5 }
  0x23   :  { %410 = vmatpush.msrb.mxu2 %v1724_v7 }
  0x24   :  { %523 = vmatpush.msra.mxu3 %v1707_v1  ;;  %642 = vmatpush.msrb.mxu0 %v1724_v7 }
  0x25   :  { %871 = vmatpush.msra.mxu2 %v1707_v1 }
  0x26   :  { %524 = vmatpush.msra.mxu3 %v1713_v3 }
  0x27   :  { %872 = vmatpush.msra.mxu2 %v1713_v3 }
  0x28   :  { %525 = vmatpush.msra.mxu3 %v1718_v5 }
  0x29   :  { %873 = vmatpush.msra.mxu2 %v1718_v5 }
  0x2a   :  { %526 = vmatpush.msra.mxu3 %v1724_v7 }
  0x2b   :  { %874 = vmatpush.msra.mxu2 %v1724_v7 }
  0x9a   :  { %v136_v17 = vpop.f32.mrf.mxu0 }
  0x9b   :  { %v1765_v19 = vadd.f32 %v136_v17, %v108_v12 }
  0x9e   :  { %v139_v13 = vpop.f32.mrf.mxu3  ;;  %v189_v14 = vpop.f32.mrf.mxu2 }
  0x9f   :  { %v1762_v15 = vadd.f32 %v139_v13, %v108_v12  ;;  %v193_v16 = vrot.slane %v189_v14, 1  ;;  %v196_v20 = vadd.f32 %v189_v14, %v1765_v19 }
  0xa1   :  { %v197_v18 = vadd.f32 %v193_v16, %v1762_v15  ;;  %v1310_v24 = vmul.f32 -1.442695, %v196_v20 }
  0xa3   :  { %1355 = vtanh.f32 %v197_v18  ;;  %v1311_v23 = vmul.f32 -1.442695, %v197_v18 }
  0xa4   :  { %1357 = vtanh.f32 %v196_v20 }
  0xa5   :  { %1359 = vpow2.f32 %v1311_v23 }
  0xa6   :  { %1361 = vpow2.f32 %v1310_v24 }
  0xa9   :  { %v1356_v21 = vpop.eup %1355 }
  0xaa   :  { %244 = vrot.lane.b32.xlu0 %v1356_v21, %s1638_s16  ;;  %v1358_v22 = vpop.eup %1357 }
  0xab   :  { %v1360_v25 = vpop.eup %1359 }
  0xac   :  { %v205_v26 = vadd.f32 1.0, %v1360_v25  ;;  %v1362_v27 = vpop.eup %1361 }
  0xad   :  { %v204_v28 = vadd.f32 1.0, %v1362_v27 }
  0xae   :  { %1363 = vrcp.f32 %v205_v26  ;;  %v232_v37 = vand.u32 2147483648, %v205_v26  ;;  %vm226_vm2 = vweird.f32 %v205_v26  ;;  %v230_v38 = vand.u32 2147483647, %v205_v26 }
  0xaf   :  { %1365 = vrcp.f32 %v204_v28  ;;  %v217_v46 = vand.u32 2147483648, %v204_v28  ;;  %vm211_vm6 = vweird.f32 %v204_v28  ;;  %v215_v47 = vand.u32 2147483647, %v204_v28 }
  0xb0   :  { %v233_v41 = vor.u32 1.1754944e-38, %v232_v37  ;;  %vm231_vm4 = vcmp.eq.f32.partialorder %v230_v38, 8.507059e+37 }
  0xb1   :  { %v218_v49 = vor.u32 1.1754944e-38, %v217_v46  ;;  %vm216_vm8 = vcmp.eq.f32.partialorder %v215_v47, 8.507059e+37 }
  0xb2   :  { %242 = vrot.lane.b32.xlu0 %v1358_v22, %s1638_s16 }
  0xb4   :  { %v1364_v29 = vpop.eup %1363 }
  0xb5   :  { %v222_v30 = vmul.f32 %v1364_v29, %v205_v26  ;;  %v1366_v32 = vpop.eup %1365  ;;  %vm227_vm1 = vweird.f32 %v1364_v29 }
  0xb6   :  { %v207_v34 = vmul.f32 %v1366_v32, %v204_v28  ;;  %vm228_vm3 = vmor %vm226_vm2, %vm227_vm1  ;;  %vm212_vm5 = vweird.f32 %v1366_v32 }
  0xb7   :  { %v223_v31 = vsub.f32 1.0, %v222_v30  ;;  %vm213_vm7 = vmor %vm211_vm6, %vm212_vm5 }
  0xb8   :  { %v208_v36 = vsub.f32 1.0, %v207_v34 }
  0xb9   :  { %v224_v33 = vmul.f32 %v1364_v29, %v223_v31 }
  0xba   :  { %v209_v40 = vmul.f32 %v1366_v32, %v208_v36 }
  0xbb   :  { %v225_v35 = vadd.f32 %v1364_v29, %v224_v33 }
  0xbc   :  { %v210_v45 = vadd.f32 %v1366_v32, %v209_v40 }
  0xbd   :  { %v229_v39 = vsel %vm228_vm3, %v1364_v29, %v225_v35 }
  0xbe   :  { %v234_v43 = vsel %vm231_vm4, %v233_v41, %v229_v39  ;;  %v214_v48 = vsel %vm213_vm7, %v1366_v32, %v210_v45 }
  0xbf   :  { %v219_v51 = vsel %vm216_vm8, %v218_v49, %v214_v48  ;;  %v239_v53 = vmul.f32 0.0, %v234_v43 }
  0xc0   :  { %v238_v56 = vmul.f32 0.0, %v219_v51 }
 0x11c   :  { %v245_v42 = vpop.permute.xlu0 %244 }
 0x11d   :  { %v249_v44 = vmul.f32 %v245_v42, %v234_v43 }
 0x11f   :  { %254 = vrot.lane.b32.xlu1 %v249_v44, %s1638_s16 }
 0x124   :  { %v243_v50 = vpop.permute.xlu0 %242 }
 0x125   :  { %v248_v52 = vmul.f32 %v243_v50, %v219_v51 }
 0x127   :  { %252 = vrot.lane.b32.xlu1 %v248_v52, %s1638_s16 }
 0x191   :  { %v255_v54 = vpop.permute.xlu1 %254 }
 0x192   :  { %v1772_v55 = vadd.f32 %v255_v54, %v239_v53 }
 0x194   :  { %1367 = vtanh.f32 %v1772_v55  ;;  %v350_v49 = vrot.slane %v1772_v55, 7 }
 0x199   :  { %v253_v57 = vpop.permute.xlu1 %252 }
 0x19a   :  { %v1368_v58 = vpop.eup %1367  ;;  %v1775_v59 = vadd.f32 %v253_v57, %v238_v56 }
 0x19b   :  { %266 = vrot.lane.b32.xlu2 %v1368_v58, %s1638_s16 }
 0x19c   :  { %1369 = vtanh.f32 %v1775_v59  ;;  %v349_v54 = vrot.slane %v1775_v59, 7 }
 0x1a2   :  { %v1370_v60 = vpop.eup %1369 }
 0x1a3   :  { %264 = vrot.lane.b32.xlu2 %v1370_v60, %s1638_s16 }
 0x1f5   :  { %v267_v61 = vpop.permute.xlu2 %266 }
 0x1f6   :  { %v271_v62 = vmul.f32 %v267_v61, %v234_v43 }
 0x1f8   :  { %v274_v0 = vrot.slane %v271_v62, 7 }
 0x1fd   :  { %v265_v63 = vpop.permute.xlu2 %264 }
 0x1fe   :  { %v270_v2 = vmul.f32 %v265_v63, %v219_v51 }
 0x200   :  { %v276_v4 = vsel %vm275_vm9, %v274_v0, %v270_v2 }
 0x201   :  { %277 = vrot.lane.b32.xlu0 %v276_v4, %s1639_s2 }
 0x273   :  { %v278_v6 = vpop.permute.xlu0 %277 }
 0x274   :  { %1312 = vmatmul.msk.f32.vlgmr.msrb.gmra.mxu3 %vm112_vm0, %v278_v6 }
 0x275   :  { %987 = vmatpush.msrb.mxu3 %v1707_v1 }
 0x277   :  { %988 = vmatpush.msrb.mxu3 %v1713_v3 }
 0x279   :  { %989 = vmatpush.msrb.mxu3 %v1718_v5 }
 0x27b   :  { %990 = vmatpush.msrb.mxu3 %v1724_v7 }
 0x2f7   :  { %v298_v10 = vpop.f32.mrf.mxu3 }
 0x2f8   :  { %v302_v12 = vrot.slane %v298_v10, 7  ;;  %v306_v13 = vadd.f32 %v298_v10, %v1762_v15 }
 0x2fa   :  { %v305_v14 = vadd.f32 %v302_v12, %v1765_v19  ;;  %1371 = vtanh.f32 %v306_v13  ;;  %v1314_v18 = vmul.f32 -1.442695, %v306_v13 }
 0x2fc   :  { %1373 = vtanh.f32 %v305_v14  ;;  %v1313_v24 = vmul.f32 -1.442695, %v305_v14 }
 0x2fd   :  { %1375 = vpow2.f32 %v1314_v18 }
 0x300   :  { %v1372_v16 = vpop.eup %1371 }
 0x301   :  { %359 = vrot.lane.b32.xlu2 %v1372_v16, %s1638_s16 }
 0x302   :  { %v1374_v17 = vpop.eup %1373 }
 0x303   :  { %357 = vrot.lane.b32.xlu1 %v1374_v17, %s1638_s16  ;;  %v1376_v20 = vpop.eup %1375 }
 0x304   :  { %v314_v21 = vadd.f32 1.0, %v1376_v20 }
 0x306   :  { %1377 = vrcp.f32 %v314_v21  ;;  %v341_v29 = vand.u32 2147483648, %v314_v21  ;;  %vm335_vm11 = vweird.f32 %v314_v21  ;;  %v339_v31 = vand.u32 2147483647, %v314_v21 }
 0x307   :  { %1379 = vpow2.f32 %v1313_v24 }
 0x308   :  { %v342_v33 = vor.u32 1.1754944e-38, %v341_v29  ;;  %vm340_vm13 = vcmp.eq.f32.partialorder %v339_v31, 8.507059e+37 }
 0x30c   :  { %v1378_v22 = vpop.eup %1377 }
 0x30d   :  { %v331_v23 = vmul.f32 %v1378_v22, %v314_v21  ;;  %v1380_v27 = vpop.eup %1379  ;;  %vm336_vm10 = vweird.f32 %v1378_v22 }
 0x30e   :  { %v313_v30 = vadd.f32 1.0, %v1380_v27  ;;  %vm337_vm12 = vmor %vm335_vm11, %vm336_vm10 }
 0x30f   :  { %v332_v25 = vsub.f32 1.0, %v331_v23 }
 0x310   :  { %1381 = vrcp.f32 %v313_v30  ;;  %v326_v42 = vand.u32 2147483648, %v313_v30  ;;  %vm320_vm15 = vweird.f32 %v313_v30  ;;  %v324_v43 = vand.u32 2147483647, %v313_v30 }
 0x311   :  { %v333_v26 = vmul.f32 %v1378_v22, %v332_v25 }
 0x312   :  { %v327_v45 = vor.u32 1.1754944e-38, %v326_v42  ;;  %vm325_vm2 = vcmp.eq.f32.partialorder %v324_v43, 8.507059e+37 }
 0x313   :  { %v334_v28 = vadd.f32 %v1378_v22, %v333_v26 }
 0x315   :  { %v338_v32 = vsel %vm337_vm12, %v1378_v22, %v334_v28 }
 0x316   :  { %v343_v35 = vsel %vm340_vm13, %v342_v33, %v338_v32  ;;  %v1382_v37 = vpop.eup %1381 }
 0x317   :  { %v316_v38 = vmul.f32 %v1382_v37, %v313_v30  ;;  %vm321_vm14 = vweird.f32 %v1382_v37  ;;  %v354_v50 = vmul.f32 %v350_v49, %v343_v35 }
 0x318   :  { %vm322_vm1 = vmor %vm320_vm15, %vm321_vm14 }
 0x319   :  { %v317_v39 = vsub.f32 1.0, %v316_v38 }
 0x31b   :  { %v318_v40 = vmul.f32 %v1382_v37, %v317_v39 }
 0x31d   :  { %v319_v41 = vadd.f32 %v1382_v37, %v318_v40 }
 0x31f   :  { %v323_v44 = vsel %vm322_vm1, %v1382_v37, %v319_v41 }
 0x320   :  { %v328_v47 = vsel %vm325_vm2, %v327_v45, %v323_v44 }
 0x321   :  { %v353_v56 = vmul.f32 %v349_v54, %v328_v47 }
 0x35b   :  { %v360_v34 = vpop.permute.xlu2 %359 }
 0x35c   :  { %v364_v36 = vmul.f32 %v360_v34, %v343_v35 }
 0x35e   :  { %369 = vrot.lane.b32.xlu1 %v364_v36, %s1638_s16 }
 0x375   :  { %v358_v46 = vpop.permute.xlu1 %357 }
 0x376   :  { %v363_v48 = vmul.f32 %v358_v46, %v328_v47 }
 0x378   :  { %367 = vrot.lane.b32.xlu0 %v363_v48, %s1638_s16 }
 0x3d0   :  { %v370_v51 = vpop.permute.xlu1 %369 }
 0x3d1   :  { %v1794_v52 = vadd.f32 %v370_v51, %v354_v50 }
 0x3d3   :  { %1383 = vtanh.f32 %v1794_v52  ;;  %v465_v49 = vrot.slane %v1794_v52, 7 }
 0x3d9   :  { %v1384_v53 = vpop.eup %1383 }
 0x3da   :  { %381 = vrot.lane.b32.xlu0 %v1384_v53, %s1638_s16 }
 0x3ea   :  { %v368_v57 = vpop.permute.xlu0 %367 }
 0x3eb   :  { %v1799_v58 = vadd.f32 %v368_v57, %v353_v56 }
 0x3ed   :  { %1385 = vtanh.f32 %v1799_v58  ;;  %v464_v48 = vrot.slane %v1799_v58, 7 }
 0x3f3   :  { %v1386_v60 = vpop.eup %1385 }
 0x3f4   :  { %379 = vrot.lane.b32.xlu2 %v1386_v60, %s1638_s16 }
 0x44c   :  { %v382_v55 = vpop.permute.xlu0 %381 }
 0x44d   :  { %v386_v63 = vmul.f32 %v382_v55, %v343_v35 }
 0x44e   :  { %v380_v61 = vpop.permute.xlu2 %379 }
 0x44f   :  { %v385_v62 = vmul.f32 %v380_v61, %v328_v47 }
 0x451   :  { %v389_v0 = vrot.slane %v385_v62, 1 }
 0x453   :  { %v390_v2 = vsel %vm275_vm9, %v386_v63, %v389_v0 }
 0x454   :  { %391 = vrot.lane.b32.xlu1 %v390_v2, %s1639_s2 }
 0x4c6   :  { %v392_v4 = vpop.permute.xlu1 %391 }
 0x4c7   :  { %1315 = vmatmul.msk.f32.vlgmr.msrb.gmra.mxu2 %vm112_vm0, %v392_v4 }
 0x54a   :  { %v412_v59 = vpop.f32.mrf.mxu2 }
 0x54b   :  { %v416_v6 = vrot.slane %v412_v59, 6  ;;  %v417_v10 = vrot.slane %v412_v59, 7 }
 0x54d   :  { %v420_v12 = vadd.f32 %v416_v6, %v1765_v19  ;;  %v421_v13 = vadd.f32 %v417_v10, %v1762_v15 }
 0x54f   :  { %1387 = vtanh.f32 %v420_v12  ;;  %v1316_v17 = vmul.f32 -1.442695, %v420_v12  ;;  %v1317_v22 = vmul.f32 -1.442695, %v421_v13 }
 0x550   :  { %1389 = vtanh.f32 %v421_v13 }
 0x551   :  { %1391 = vpow2.f32 %v1316_v17 }
 0x555   :  { %v1388_v14 = vpop.eup %1387 }
 0x556   :  { %v1390_v16 = vpop.eup %1389  ;;  %472 = vrot.lane.b32.xlu2 %v1388_v14, %s1638_s16 }
 0x557   :  { %474 = vrot.lane.b32.xlu0 %v1390_v16, %s1638_s16  ;;  %v1392_v18 = vpop.eup %1391 }
 0x558   :  { %v428_v20 = vadd.f32 1.0, %v1392_v18 }
 0x55a   :  { %1393 = vrcp.f32 %v428_v20  ;;  %v441_v29 = vand.u32 2147483648, %v428_v20  ;;  %vm435_vm4 = vweird.f32 %v428_v20  ;;  %v439_v30 = vand.u32 2147483647, %v428_v20 }
 0x55b   :  { %1395 = vpow2.f32 %v1317_v22 }
 0x55c   :  { %v442_v32 = vor.u32 1.1754944e-38, %v441_v29  ;;  %vm440_vm6 = vcmp.eq.f32.partialorder %v439_v30, 8.507059e+37 }
 0x560   :  { %v1394_v21 = vpop.eup %1393 }
 0x561   :  { %v431_v23 = vmul.f32 %v1394_v21, %v428_v20  ;;  %v1396_v26 = vpop.eup %1395  ;;  %vm436_vm3 = vweird.f32 %v1394_v21 }
 0x562   :  { %v429_v27 = vadd.f32 1.0, %v1396_v26  ;;  %vm437_vm5 = vmor %vm435_vm4, %vm436_vm3 }
 0x563   :  { %v432_v24 = vsub.f32 1.0, %v431_v23 }
 0x564   :  { %1397 = vrcp.f32 %v429_v27  ;;  %v456_v41 = vand.u32 2147483648, %v429_v27  ;;  %vm450_vm8 = vweird.f32 %v429_v27  ;;  %v454_v42 = vand.u32 2147483647, %v429_v27 }
 0x565   :  { %v433_v25 = vmul.f32 %v1394_v21, %v432_v24 }
 0x566   :  { %v457_v44 = vor.u32 1.1754944e-38, %v456_v41  ;;  %vm455_vm11 = vcmp.eq.f32.partialorder %v454_v42, 8.507059e+37 }
 0x567   :  { %v434_v28 = vadd.f32 %v1394_v21, %v433_v25 }
 0x569   :  { %v438_v31 = vsel %vm437_vm5, %v1394_v21, %v434_v28 }
 0x56a   :  { %v443_v34 = vsel %vm440_vm6, %v442_v32, %v438_v31  ;;  %v1398_v36 = vpop.eup %1397 }
 0x56b   :  { %v446_v37 = vmul.f32 %v1398_v36, %v429_v27  ;;  %vm451_vm7 = vweird.f32 %v1398_v36  ;;  %v468_v50 = vmul.f32 %v464_v48, %v443_v34 }
 0x56c   :  { %vm452_vm10 = vmor %vm450_vm8, %vm451_vm7 }
 0x56d   :  { %v447_v38 = vsub.f32 1.0, %v446_v37 }
 0x56f   :  { %v448_v39 = vmul.f32 %v1398_v36, %v447_v38 }
 0x571   :  { %v449_v40 = vadd.f32 %v1398_v36, %v448_v39 }
 0x573   :  { %v453_v43 = vsel %vm452_vm10, %v1398_v36, %v449_v40 }
 0x574   :  { %v458_v46 = vsel %vm455_vm11, %v457_v44, %v453_v43 }
 0x575   :  { %v469_v51 = vmul.f32 %v465_v49, %v458_v46 }
 0x5b0   :  { %v473_v33 = vpop.permute.xlu2 %472 }
 0x5b1   :  { %v478_v35 = vmul.f32 %v473_v33, %v443_v34 }
 0x5b3   :  { %482 = vrot.lane.b32.xlu1 %v478_v35, %s1638_s16 }
 0x5c9   :  { %v475_v45 = vpop.permute.xlu0 %474 }
 0x5ca   :  { %v479_v47 = vmul.f32 %v475_v45, %v458_v46 }
 0x5cc   :  { %484 = vrot.lane.b32.xlu2 %v479_v47, %s1638_s16 }
 0x625   :  { %v483_v53 = vpop.permute.xlu1 %482 }
 0x626   :  { %v485_v54 = vpop.permute.xlu2 %484  ;;  %v1814_v56 = vadd.f32 %v483_v53, %v468_v50 }
 0x627   :  { %v1816_v57 = vadd.f32 %v485_v54, %v469_v51 }
 0x628   :  { %1399 = vtanh.f32 %v1814_v56  ;;  %v580_v48 = vrot.slane %v1814_v56, 7 }
 0x629   :  { %1401 = vtanh.f32 %v1816_v57  ;;  %v581_v54 = vrot.slane %v1816_v57, 7 }
 0x62e   :  { %v1400_v60 = vpop.eup %1399 }
 0x62f   :  { %v1402_v55 = vpop.eup %1401  ;;  %494 = vrot.lane.b32.xlu0 %v1400_v60, %s1638_s16 }
 0x630   :  { %496 = vrot.lane.b32.xlu1 %v1402_v55, %s1638_s16 }
 0x6a1   :  { %v495_v58 = vpop.permute.xlu0 %494 }
 0x6a2   :  { %v497_v52 = vpop.permute.xlu1 %496  ;;  %v500_v61 = vmul.f32 %v495_v58, %v443_v34 }
 0x6a3   :  { %v501_v62 = vmul.f32 %v497_v52, %v458_v46 }
 0x6a4   :  { %v504_v63 = vrot.slane %v500_v61, 2 }
 0x6a5   :  { %v505_v0 = vrot.slane %v501_v62, 1 }
 0x6a7   :  { %v506_v2 = vsel %vm275_vm9, %v505_v0, %v504_v63 }
 0x6a8   :  { %507 = vrot.lane.b32.xlu2 %v506_v2, %s1639_s2 }
 0x702   :  { %v508_v4 = vpop.permute.xlu2 %507 }
 0x703   :  { %1318 = vmatmul.msk.f32.vlgmr.msra.gmra.mxu3 %vm112_vm0, %v508_v4 }
 0x786   :  { %v528_v59 = vpop.f32.mrf.mxu3 }
 0x787   :  { %v532_v6 = vrot.slane %v528_v59, 5  ;;  %v533_v10 = vrot.slane %v528_v59, 6 }
 0x789   :  { %v536_v12 = vadd.f32 %v532_v6, %v1765_v19  ;;  %v537_v13 = vadd.f32 %v533_v10, %v1762_v15 }
 0x78b   :  { %1403 = vtanh.f32 %v536_v12  ;;  %v1319_v17 = vmul.f32 -1.442695, %v536_v12  ;;  %v1320_v18 = vmul.f32 -1.442695, %v537_v13 }
 0x78c   :  { %1405 = vtanh.f32 %v537_v13 }
 0x78d   :  { %1407 = vpow2.f32 %v1319_v17 }
 0x78e   :  { %1409 = vpow2.f32 %v1320_v18 }
 0x791   :  { %v1404_v14 = vpop.eup %1403 }
 0x792   :  { %v1406_v16 = vpop.eup %1405  ;;  %588 = vrot.lane.b32.xlu0 %v1404_v14, %s1638_s16 }
 0x793   :  { %590 = vrot.lane.b32.xlu1 %v1406_v16, %s1638_s16  ;;  %v1408_v20 = vpop.eup %1407 }
 0x794   :  { %v1410_v21 = vpop.eup %1409  ;;  %v544_v22 = vadd.f32 1.0, %v1408_v20 }
 0x795   :  { %v545_v23 = vadd.f32 1.0, %v1410_v21 }
 0x796   :  { %1411 = vrcp.f32 %v544_v22  ;;  %v557_v34 = vand.u32 2147483648, %v544_v22  ;;  %vm551_vm14 = vweird.f32 %v544_v22  ;;  %v555_v36 = vand.u32 2147483647, %v544_v22 }
 0x797   :  { %1413 = vrcp.f32 %v545_v23  ;;  %v572_v35 = vand.u32 2147483648, %v545_v23  ;;  %vm566_vm15 = vweird.f32 %v545_v23  ;;  %v570_v37 = vand.u32 2147483647, %v545_v23 }
 0x798   :  { %v558_v40 = vor.u32 1.1754944e-38, %v557_v34  ;;  %vm556_vm3 = vcmp.eq.f32.partialorder %v555_v36, 8.507059e+37 }
 0x799   :  { %v573_v41 = vor.u32 1.1754944e-38, %v572_v35  ;;  %vm571_vm4 = vcmp.eq.f32.partialorder %v570_v37, 8.507059e+37 }
 0x79c   :  { %v1412_v24 = vpop.eup %1411 }
 0x79d   :  { %v1414_v25 = vpop.eup %1413  ;;  %v547_v26 = vmul.f32 %v1412_v24, %v544_v22  ;;  %vm552_vm12 = vweird.f32 %v1412_v24 }
 0x79e   :  { %v562_v27 = vmul.f32 %v1414_v25, %v545_v23  ;;  %vm567_vm13 = vweird.f32 %v1414_v25  ;;  %vm553_vm1 = vmor %vm551_vm14, %vm552_vm12 }
 0x79f   :  { %v548_v28 = vsub.f32 1.0, %v547_v26  ;;  %vm568_vm2 = vmor %vm566_vm15, %vm567_vm13 }
 0x7a0   :  { %v563_v29 = vsub.f32 1.0, %v562_v27 }
 0x7a1   :  { %v549_v30 = vmul.f32 %v1412_v24, %v548_v28 }
 0x7a2   :  { %v564_v31 = vmul.f32 %v1414_v25, %v563_v29 }
 0x7a3   :  { %v550_v32 = vadd.f32 %v1412_v24, %v549_v30 }
 0x7a4   :  { %v565_v33 = vadd.f32 %v1414_v25, %v564_v31 }
 0x7a5   :  { %v554_v38 = vsel %vm553_vm1, %v1412_v24, %v550_v32 }
 0x7a6   :  { %v569_v39 = vsel %vm568_vm2, %v1414_v25, %v565_v33  ;;  %v559_v43 = vsel %vm556_vm3, %v558_v40, %v554_v38 }
 0x7a7   :  { %v574_v45 = vsel %vm571_vm4, %v573_v41, %v569_v39  ;;  %v584_v49 = vmul.f32 %v580_v48, %v559_v43 }
 0x7a8   :  { %v585_v60 = vmul.f32 %v581_v54, %v574_v45 }
 0x804   :  { %v589_v42 = vpop.permute.xlu0 %588 }
 0x805   :  { %v591_v44 = vpop.permute.xlu1 %590  ;;  %v594_v46 = vmul.f32 %v589_v42, %v559_v43 }
 0x806   :  { %v595_v47 = vmul.f32 %v591_v44, %v574_v45 }
 0x807   :  { %598 = vrot.lane.b32.xlu2 %v594_v46, %s1638_s16 }
 0x808   :  { %600 = vrot.lane.b32.xlu0 %v595_v47, %s1638_s16 }
 0x861   :  { %v599_v50 = vpop.permute.xlu2 %598 }
 0x862   :  { %v1832_v51 = vadd.f32 %v599_v50, %v584_v49 }
 0x864   :  { %1415 = vtanh.f32 %v1832_v51 }
 0x86a   :  { %v1416_v53 = vpop.eup %1415 }
 0x86b   :  { %610 = vrot.lane.b32.xlu1 %v1416_v53, %s1638_s16 }
 0x87a   :  { %v601_v55 = vpop.permute.xlu0 %600 }
 0x87b   :  { %v1837_v58 = vadd.f32 %v601_v55, %v585_v60  ;;  %v696_v60 = vrot.slane %v1832_v51, 7  ;;  %v101_v51 = vld [vmem:[%s2001_s1 + $0x18] sm:$0xff] }
 0x87d   :  { %1417 = vtanh.f32 %v1837_v58  ;;  %v697_v48 = vrot.slane %v1837_v58, 7  ;;  %v105_v58 = vld [vmem:[%s2001_s1 + $0x38] sm:$0xff] }
 0x87e   :  { %154 = vmatpush.msra.mxu1 %v105_v58 }
 0x883   :  { %v1418_v52 = vpop.eup %1417 }
 0x884   :  { %612 = vrot.lane.b32.xlu2 %v1418_v52, %s1638_s16 }
 0x8dd   :  { %v611_v56 = vpop.permute.xlu1 %610 }
 0x8de   :  { %v613_v61 = vpop.permute.xlu2 %612  ;;  %v616_v62 = vmul.f32 %v611_v56, %v559_v43 }
 0x8df   :  { %v617_v63 = vmul.f32 %v613_v61, %v574_v45 }
 0x8e0   :  { %v620_v0 = vrot.slane %v616_v62, 3  ;;  %v103_v62 = vld [vmem:[%s2001_s1 + $0x28] sm:$0xff] }
 0x8e1   :  { %v621_v2 = vrot.slane %v617_v63, 2  ;;  %155 = vmatpush.msra.mxu1 %v103_v62  ;;  %v99_v63 = vld [vmem:[%s2001_s1 + $0x8] sm:$0xff]  ;;  %s1640_s1 = smov 96  }
 0x8e3   :  { %v622_v4 = vsel %vm275_vm9, %v621_v2, %v620_v0  ;;  %156 = vmatpush.msra.mxu1 %v101_v51 }
 0x8e4   :  { %623 = vrot.lane.b32.xlu0 %v622_v4, %s1639_s2 }
 0x8e5   :  { %157 = vmatpush.msra.mxu1 %v99_v63 }
 0x8e6   :  { %1308 = vmatmul.msk.f32.vlgmr.msra.gmra.mxu1 %vm112_vm0, %v1730_v9 }
 0x8e7   :  { %755 = vmatpush.msrb.mxu1 %v1707_v1  ;;  %v109_v1 = vperm.slane %v1759_v11, 1 }
 0x8e9   :  { %756 = vmatpush.msrb.mxu1 %v1713_v3 }
 0x8eb   :  { %757 = vmatpush.msrb.mxu1 %v1718_v5 }
 0x8ed   :  { %758 = vmatpush.msrb.mxu1 %v1724_v7 }
 0x8ee   :  { %1309 = vmatmul.msk.f32.gmra.mxu1 %vm112_vm0, %v1727_v8 }
 0x956   :  { %v624_v57 = vpop.permute.xlu0 %623 }
 0x957   :  { %1321 = vmatmul.msk.f32.vlgmr.msrb.gmra.mxu0 %vm112_vm0, %v624_v57 }
 0x963   :  { %v159_v3 = vpop.f32.mrf.mxu1 }
 0x964   :  { %v1885_v5 = vadd.f32 %v159_v3, %v109_v1 }
 0x96b   :  { %v1888_v8 = vpop.f32.mrf.mxu1 }
 0x9d4   :  { %v644_v59 = vpop.f32.mrf.mxu0 }
 0x9d5   :  { %v648_v6 = vrot.slane %v644_v59, 4  ;;  %v649_v10 = vrot.slane %v644_v59, 5 }
 0x9d7   :  { %v652_v12 = vadd.f32 %v648_v6, %v1765_v19  ;;  %v653_v13 = vadd.f32 %v649_v10, %v1762_v15 }
 0x9d9   :  { %1419 = vtanh.f32 %v652_v12  ;;  %v1323_v17 = vmul.f32 -1.442695, %v653_v13  ;;  %v1322_v22 = vmul.f32 -1.442695, %v652_v12 }
 0x9da   :  { %1421 = vtanh.f32 %v653_v13 }
 0x9db   :  { %1423 = vpow2.f32 %v1323_v17 }
 0x9df   :  { %v1420_v14 = vpop.eup %1419 }
 0x9e0   :  { %v1422_v16 = vpop.eup %1421  ;;  %704 = vrot.lane.b32.xlu1 %v1420_v14, %s1638_s16 }
 0x9e1   :  { %706 = vrot.lane.b32.xlu2 %v1422_v16, %s1638_s16  ;;  %v1424_v18 = vpop.eup %1423 }
 0x9e2   :  { %v661_v20 = vadd.f32 1.0, %v1424_v18 }
 0x9e4   :  { %1425 = vrcp.f32 %v661_v20  ;;  %v688_v29 = vand.u32 2147483648, %v661_v20  ;;  %vm682_vm6 = vweird.f32 %v661_v20  ;;  %v686_v30 = vand.u32 2147483647, %v661_v20 }
 0x9e5   :  { %1427 = vpow2.f32 %v1322_v22 }
 0x9e6   :  { %v689_v32 = vor.u32 1.1754944e-38, %v688_v29  ;;  %vm687_vm8 = vcmp.eq.f32.partialorder %v686_v30, 8.507059e+37 }
 0x9ea   :  { %v1426_v21 = vpop.eup %1425 }
 0x9eb   :  { %v678_v23 = vmul.f32 %v1426_v21, %v661_v20  ;;  %v1428_v25 = vpop.eup %1427  ;;  %vm683_vm5 = vweird.f32 %v1426_v21 }
 0x9ec   :  { %v660_v27 = vadd.f32 1.0, %v1428_v25  ;;  %vm684_vm7 = vmor %vm682_vm6, %vm683_vm5 }
 0x9ed   :  { %v679_v24 = vsub.f32 1.0, %v678_v23 }
 0x9ee   :  { %1429 = vrcp.f32 %v660_v27  ;;  %v673_v41 = vand.u32 2147483648, %v660_v27  ;;  %vm667_vm11 = vweird.f32 %v660_v27  ;;  %v671_v42 = vand.u32 2147483647, %v660_v27 }
 0x9ef   :  { %v680_v26 = vmul.f32 %v1426_v21, %v679_v24 }
 0x9f0   :  { %v674_v44 = vor.u32 1.1754944e-38, %v673_v41  ;;  %vm672_vm13 = vcmp.eq.f32.partialorder %v671_v42, 8.507059e+37 }
 0x9f1   :  { %v681_v28 = vadd.f32 %v1426_v21, %v680_v26 }
 0x9f3   :  { %v685_v31 = vsel %vm684_vm7, %v1426_v21, %v681_v28 }
 0x9f4   :  { %v690_v34 = vsel %vm687_vm8, %v689_v32, %v685_v31  ;;  %v1430_v35 = vpop.eup %1429 }
 0x9f5   :  { %v663_v37 = vmul.f32 %v1430_v35, %v660_v27  ;;  %vm668_vm10 = vweird.f32 %v1430_v35  ;;  %v701_v49 = vmul.f32 %v697_v48, %v690_v34 }
 0x9f6   :  { %vm669_vm12 = vmor %vm667_vm11, %vm668_vm10 }
 0x9f7   :  { %v664_v38 = vsub.f32 1.0, %v663_v37 }
 0x9f9   :  { %v665_v39 = vmul.f32 %v1430_v35, %v664_v38 }
 0x9fb   :  { %v666_v40 = vadd.f32 %v1430_v35, %v665_v39 }
 0x9fd   :  { %v670_v43 = vsel %vm669_vm12, %v1430_v35, %v666_v40 }
 0x9fe   :  { %v675_v46 = vsel %vm672_vm13, %v674_v44, %v670_v43 }
 0x9ff   :  { %v700_v55 = vmul.f32 %v696_v60, %v675_v46 }
 0xa3b   :  { %v707_v33 = vpop.permute.xlu2 %706 }
 0xa3c   :  { %v711_v36 = vmul.f32 %v707_v33, %v690_v34 }
 0xa3e   :  { %716 = vrot.lane.b32.xlu1 %v711_v36, %s1638_s16 }
 0xa52   :  { %v705_v45 = vpop.permute.xlu1 %704 }
 0xa53   :  { %v710_v47 = vmul.f32 %v705_v45, %v675_v46 }
 0xa55   :  { %714 = vrot.lane.b32.xlu0 %v710_v47, %s1638_s16 }
 0xab0   :  { %v717_v50 = vpop.permute.xlu1 %716 }
 0xab1   :  { %v1851_v53 = vadd.f32 %v717_v50, %v701_v49 }
 0xab3   :  { %1431 = vtanh.f32 %v1851_v53 }
 0xab9   :  { %v1432_v54 = vpop.eup %1431 }
 0xaba   :  { %728 = vrot.lane.b32.xlu0 %v1432_v54, %s1638_s16  ;;  %v813_v54 = vrot.slane %v1851_v53, 7 }
 0xac7   :  { %v715_v52 = vpop.permute.xlu0 %714 }
 0xac8   :  { %v1856_v56 = vadd.f32 %v715_v52, %v700_v55 }
 0xaca   :  { %1433 = vtanh.f32 %v1856_v56  ;;  %v812_v50 = vrot.slane %v1856_v56, 7 }
 0xad0   :  { %v1434_v61 = vpop.eup %1433 }
 0xad1   :  { %726 = vrot.lane.b32.xlu2 %v1434_v61, %s1638_s16 }
 0xb2b   :  { %v727_v0 = vpop.permute.xlu2 %726 }
 0xb2c   :  { %v729_v2 = vpop.permute.xlu0 %728  ;;  %v732_v4 = vmul.f32 %v727_v0, %v675_v46 }
 0xb2d   :  { %v733_v57 = vmul.f32 %v729_v2, %v690_v34 }
 0xb2e   :  { %v736_v59 = vrot.slane %v732_v4, 4 }
 0xb2f   :  { %v737_v6 = vrot.slane %v733_v57, 3 }
 0xb31   :  { %v738_v10 = vsel %vm275_vm9, %v737_v6, %v736_v59 }
 0xb32   :  { %739 = vrot.lane.b32.xlu1 %v738_v10, %s1639_s2 }
 0xba4   :  { %v740_v7 = vpop.permute.xlu1 %739 }
 0xba5   :  { %1324 = vmatmul.msk.f32.vlgmr.msrb.gmra.mxu1 %vm112_vm0, %v740_v7 }
 0xc22   :  { %v760_v9 = vpop.f32.mrf.mxu1 }
 0xc23   :  { %v764_v12 = vrot.slane %v760_v9, 3  ;;  %v765_v13 = vrot.slane %v760_v9, 4 }
 0xc25   :  { %v768_v14 = vadd.f32 %v764_v12, %v1765_v19  ;;  %v769_v16 = vadd.f32 %v765_v13, %v1762_v15 }
 0xc27   :  { %1435 = vtanh.f32 %v768_v14  ;;  %v1325_v20 = vmul.f32 -1.442695, %v768_v14  ;;  %v1326_v24 = vmul.f32 -1.442695, %v769_v16 }
 0xc28   :  { %1437 = vtanh.f32 %v769_v16 }
 0xc29   :  { %1439 = vpow2.f32 %v1325_v20 }
 0xc2d   :  { %v1436_v17 = vpop.eup %1435 }
 0xc2e   :  { %v1438_v18 = vpop.eup %1437  ;;  %820 = vrot.lane.b32.xlu2 %v1436_v17, %s1638_s16 }
 0xc2f   :  { %822 = vrot.lane.b32.xlu0 %v1438_v18, %s1638_s16  ;;  %v1440_v21 = vpop.eup %1439 }
 0xc30   :  { %v776_v22 = vadd.f32 1.0, %v1440_v21 }
 0xc32   :  { %1441 = vrcp.f32 %v776_v22  ;;  %v789_v31 = vand.u32 2147483648, %v776_v22  ;;  %vm783_vm15 = vweird.f32 %v776_v22  ;;  %v787_v32 = vand.u32 2147483647, %v776_v22 }
 0xc33   :  { %1443 = vpow2.f32 %v1326_v24 }
 0xc34   :  { %v790_v34 = vor.u32 1.1754944e-38, %v789_v31  ;;  %vm788_vm2 = vcmp.eq.f32.partialorder %v787_v32, 8.507059e+37 }
 0xc38   :  { %v1442_v23 = vpop.eup %1441 }
 0xc39   :  { %v779_v25 = vmul.f32 %v1442_v23, %v776_v22  ;;  %v1444_v28 = vpop.eup %1443  ;;  %vm784_vm14 = vweird.f32 %v1442_v23 }
 0xc3a   :  { %v777_v29 = vadd.f32 1.0, %v1444_v28  ;;  %vm785_vm1 = vmor %vm783_vm15, %vm784_vm14 }
 0xc3b   :  { %v780_v26 = vsub.f32 1.0, %v779_v25 }
 0xc3c   :  { %1445 = vrcp.f32 %v777_v29  ;;  %v804_v43 = vand.u32 2147483648, %v777_v29  ;;  %vm798_vm4 = vweird.f32 %v777_v29  ;;  %v802_v44 = vand.u32 2147483647, %v777_v29 }
 0xc3d   :  { %v781_v27 = vmul.f32 %v1442_v23, %v780_v26 }
 0xc3e   :  { %v805_v46 = vor.u32 1.1754944e-38, %v804_v43  ;;  %vm803_vm6 = vcmp.eq.f32.partialorder %v802_v44, 8.507059e+37 }
 0xc3f   :  { %v782_v30 = vadd.f32 %v1442_v23, %v781_v27 }
 0xc41   :  { %v786_v33 = vsel %vm785_vm1, %v1442_v23, %v782_v30 }
 0xc42   :  { %v791_v36 = vsel %vm788_vm2, %v790_v34, %v786_v33  ;;  %v1446_v38 = vpop.eup %1445 }
 0xc43   :  { %v794_v39 = vmul.f32 %v1446_v38, %v777_v29  ;;  %vm799_vm3 = vweird.f32 %v1446_v38  ;;  %v816_v60 = vmul.f32 %v812_v50, %v791_v36 }
 0xc44   :  { %vm800_vm5 = vmor %vm798_vm4, %vm799_vm3 }
 0xc45   :  { %v795_v40 = vsub.f32 1.0, %v794_v39 }
 0xc47   :  { %v796_v41 = vmul.f32 %v1446_v38, %v795_v40 }
 0xc49   :  { %v797_v42 = vadd.f32 %v1446_v38, %v796_v41 }
 0xc4b   :  { %v801_v45 = vsel %vm800_vm5, %v1446_v38, %v797_v42 }
 0xc4c   :  { %v806_v48 = vsel %vm803_vm6, %v805_v46, %v801_v45 }
 0xc4d   :  { %v817_v55 = vmul.f32 %v813_v54, %v806_v48 }
 0xc88   :  { %v821_v35 = vpop.permute.xlu2 %820 }
 0xc89   :  { %v826_v37 = vmul.f32 %v821_v35, %v791_v36 }
 0xc8b   :  { %830 = vrot.lane.b32.xlu1 %v826_v37, %s1638_s16 }
 0xca1   :  { %v823_v47 = vpop.permute.xlu0 %822 }
 0xca2   :  { %v827_v49 = vmul.f32 %v823_v47, %v806_v48 }
 0xca4   :  { %832 = vrot.lane.b32.xlu2 %v827_v49, %s1638_s16 }
 0xcfd   :  { %v831_v52 = vpop.permute.xlu1 %830 }
 0xcfe   :  { %v833_v61 = vpop.permute.xlu2 %832  ;;  %v1898_v58 = vadd.f32 %v831_v52, %v816_v60 }
 0xcff   :  { %v1900_v62 = vadd.f32 %v833_v61, %v817_v55 }
 0xd00   :  { %1447 = vtanh.f32 %v1898_v58  ;;  %v928_v47 = vrot.slane %v1898_v58, 7 }
 0xd01   :  { %1449 = vtanh.f32 %v1900_v62  ;;  %v929_v60 = vrot.slane %v1900_v62, 7 }
 0xd06   :  { %v1448_v51 = vpop.eup %1447 }
 0xd07   :  { %v1450_v63 = vpop.eup %1449  ;;  %842 = vrot.lane.b32.xlu0 %v1448_v51, %s1638_s16 }
 0xd08   :  { %844 = vrot.lane.b32.xlu1 %v1450_v63, %s1638_s16 }
 0xd79   :  { %v843_v56 = vpop.permute.xlu0 %842 }
 0xd7a   :  { %v845_v53 = vpop.permute.xlu1 %844  ;;  %v848_v0 = vmul.f32 %v843_v56, %v791_v36 }
 0xd7b   :  { %v849_v2 = vmul.f32 %v845_v53, %v806_v48 }
 0xd7c   :  { %v852_v4 = vrot.slane %v848_v0, 5 }
 0xd7d   :  { %v853_v57 = vrot.slane %v849_v2, 4 }
 0xd7f   :  { %v854_v59 = vsel %vm275_vm9, %v853_v57, %v852_v4 }
 0xd80   :  { %855 = vrot.lane.b32.xlu2 %v854_v59, %s1639_s2 }
 0xdda   :  { %v856_v6 = vpop.permute.xlu2 %855 }
 0xddb   :  { %1327 = vmatmul.msk.f32.vlgmr.msra.gmra.mxu2 %vm112_vm0, %v856_v6 }
 0xe5e   :  { %v876_v10 = vpop.f32.mrf.mxu2 }
 0xe5f   :  { %v880_v3 = vrot.slane %v876_v10, 2  ;;  %v881_v7 = vrot.slane %v876_v10, 3 }
 0xe61   :  { %v884_v9 = vadd.f32 %v880_v3, %v1765_v19  ;;  %v885_v12 = vadd.f32 %v881_v7, %v1762_v15 }
 0xe63   :  { %1451 = vtanh.f32 %v884_v9  ;;  %v1328_v16 = vmul.f32 -1.442695, %v884_v9  ;;  %v1329_v17 = vmul.f32 -1.442695, %v885_v12 }
 0xe64   :  { %1453 = vtanh.f32 %v885_v12  ;;  %v163_v12 = vadd.f32 %v1888_v8, %v109_v1 }
 0xe65   :  { %1455 = vpow2.f32 %v1328_v16 }
 0xe66   :  { %1457 = vpow2.f32 %v1329_v17 }
 0xe69   :  { %v1452_v13 = vpop.eup %1451 }
 0xe6a   :  { %v1454_v14 = vpop.eup %1453  ;;  %936 = vrot.lane.b32.xlu0 %v1452_v13, %s1638_s16 }
 0xe6b   :  { %938 = vrot.lane.b32.xlu1 %v1454_v14, %s1638_s16  ;;  %v1456_v18 = vpop.eup %1455 }
 0xe6c   :  { %v1458_v20 = vpop.eup %1457  ;;  %v892_v21 = vadd.f32 1.0, %v1456_v18 }
 0xe6d   :  { %v893_v22 = vadd.f32 1.0, %v1458_v20  ;;  %v1334_v20 = vmul.f32 -1.442695, %v163_v12 }
 0xe6e   :  { %1459 = vrcp.f32 %v892_v21  ;;  %v905_v33 = vand.u32 2147483648, %v892_v21  ;;  %vm899_vm10 = vweird.f32 %v892_v21  ;;  %v903_v35 = vand.u32 2147483647, %v892_v21 }
 0xe6f   :  { %1461 = vrcp.f32 %v893_v22  ;;  %v920_v34 = vand.u32 2147483648, %v893_v22  ;;  %vm914_vm11 = vweird.f32 %v893_v22  ;;  %v918_v36 = vand.u32 2147483647, %v893_v22 }
 0xe70   :  { %v906_v39 = vor.u32 1.1754944e-38, %v905_v33  ;;  %vm904_vm14 = vcmp.eq.f32.partialorder %v903_v35, 8.507059e+37 }
 0xe71   :  { %v921_v40 = vor.u32 1.1754944e-38, %v920_v34  ;;  %vm919_vm15 = vcmp.eq.f32.partialorder %v918_v36, 8.507059e+37 }
 0xe74   :  { %v1460_v23 = vpop.eup %1459 }
 0xe75   :  { %v1462_v24 = vpop.eup %1461  ;;  %v895_v25 = vmul.f32 %v1460_v23, %v892_v21  ;;  %vm900_vm7 = vweird.f32 %v1460_v23 }
 0xe76   :  { %v910_v26 = vmul.f32 %v1462_v24, %v893_v22  ;;  %vm915_vm8 = vweird.f32 %v1462_v24  ;;  %vm901_vm12 = vmor %vm899_vm10, %vm900_vm7 }
 0xe77   :  { %v896_v27 = vsub.f32 1.0, %v895_v25  ;;  %vm916_vm13 = vmor %vm914_vm11, %vm915_vm8 }
 0xe78   :  { %v911_v28 = vsub.f32 1.0, %v910_v26 }
 0xe79   :  { %v897_v29 = vmul.f32 %v1460_v23, %v896_v27 }
 0xe7a   :  { %v912_v30 = vmul.f32 %v1462_v24, %v911_v28 }
 0xe7b   :  { %v898_v31 = vadd.f32 %v1460_v23, %v897_v29 }
 0xe7c   :  { %v913_v32 = vadd.f32 %v1462_v24, %v912_v30 }
 0xe7d   :  { %v902_v37 = vsel %vm901_vm12, %v1460_v23, %v898_v31 }
 0xe7e   :  { %v917_v38 = vsel %vm916_vm13, %v1462_v24, %v913_v32  ;;  %v907_v42 = vsel %vm904_vm14, %v906_v39, %v902_v37 }
 0xe7f   :  { %v922_v44 = vsel %vm919_vm15, %v921_v40, %v917_v38  ;;  %v932_v48 = vmul.f32 %v928_v47, %v907_v42 }
 0xe80   :  { %v933_v55 = vmul.f32 %v929_v60, %v922_v44 }
 0xedc   :  { %v937_v41 = vpop.permute.xlu0 %936 }
 0xedd   :  { %v939_v43 = vpop.permute.xlu1 %938  ;;  %v942_v45 = vmul.f32 %v937_v41, %v907_v42 }
 0xede   :  { %v943_v46 = vmul.f32 %v939_v43, %v922_v44 }
 0xedf   :  { %946 = vrot.lane.b32.xlu2 %v942_v45, %s1638_s16 }
 0xee0   :  { %948 = vrot.lane.b32.xlu0 %v943_v46, %s1638_s16 }
 0xf39   :  { %v947_v49 = vpop.permute.xlu2 %946 }
 0xf3a   :  { %v1916_v50 = vadd.f32 %v947_v49, %v932_v48 }
 0xf3c   :  { %1463 = vtanh.f32 %v1916_v50 }
 0xf42   :  { %v1464_v54 = vpop.eup %1463 }
 0xf43   :  { %958 = vrot.lane.b32.xlu1 %v1464_v54, %s1638_s16 }
 0xf52   :  { %v949_v52 = vpop.permute.xlu0 %948 }
 0xf53   :  { %v1921_v61 = vadd.f32 %v949_v52, %v933_v55 }
 0xf55   :  { %1465 = vtanh.f32 %v1921_v61 }
 0xf5b   :  { %v1466_v51 = vpop.eup %1465 }
 0xf5c   :  { %960 = vrot.lane.b32.xlu2 %v1466_v51, %s1638_s16 }
 0xfb5   :  { %v959_v58 = vpop.permute.xlu1 %958 }
 0xfb6   :  { %v961_v63 = vpop.permute.xlu2 %960  ;;  %v964_v56 = vmul.f32 %v959_v58, %v907_v42 }
 0xfb7   :  { %v965_v53 = vmul.f32 %v961_v63, %v922_v44 }
 0xfb8   :  { %v968_v0 = vrot.slane %v964_v56, 6 }
 0xfb9   :  { %v969_v2 = vrot.slane %v965_v53, 5  ;;  %v1044_v53 = vrot.slane %v1916_v50, 7 }
 0xfbb   :  { %v970_v4 = vsel %vm275_vm9, %v969_v2, %v968_v0 }
 0xfbc   :  { %971 = vrot.lane.b32.xlu0 %v970_v4, %s1639_s2 }
0x102e   :  { %v972_v62 = vpop.permute.xlu0 %971 }
0x102f   :  { %1330 = vmatmul.msk.f32.vlgmr.msrb.gmra.mxu3 %vm112_vm0, %v972_v62 }
0x10b2   :  { %v992_v57 = vpop.f32.mrf.mxu3 }
0x10b3   :  { %v996_v59 = vrot.slane %v992_v57, 1  ;;  %v997_v6 = vrot.slane %v992_v57, 2  ;;  %v1333_v57 = vmul.f32 -1.442695, %v1885_v5 }
0x10b5   :  { %v1000_v10 = vadd.f32 %v996_v59, %v1765_v19  ;;  %v1001_v3 = vadd.f32 %v997_v6, %v1762_v15 }
0x10b7   :  { %1467 = vtanh.f32 %v1000_v10  ;;  %v1331_v14 = vmul.f32 -1.442695, %v1000_v10  ;;  %v1332_v17 = vmul.f32 -1.442695, %v1001_v3 }
0x10b8   :  { %1469 = vtanh.f32 %v1001_v3 }
0x10b9   :  { %1471 = vtanh.f32 %v163_v12 }
0x10ba   :  { %1473 = vpow2.f32 %v1331_v14 }
0x10bd   :  { %v1468_v7 = vpop.eup %1467 }
0x10be   :  { %v1470_v9 = vpop.eup %1469  ;;  %1052 = vrot.lane.b32.xlu2 %v1468_v7, %s1638_s16 }
0x10bf   :  { %1054 = vrot.lane.b32.xlu1 %v1470_v9, %s1638_s16  ;;  %v1472_v13 = vpop.eup %1471  ;;  %v1045_v9 = vrot.slane %v1921_v61, 7 }
0x10c0   :  { %v1474_v19 = vpop.eup %1473 }
0x10c1   :  { %v1008_v15 = vadd.f32 1.0, %v1474_v19 }
0x10c3   :  { %1475 = vrcp.f32 %v1008_v15  ;;  %v1021_v23 = vand.u32 2147483648, %v1008_v15  ;;  %vm1015_vm1 = vweird.f32 %v1008_v15  ;;  %v1019_v24 = vand.u32 2147483647, %v1008_v15 }
0x10c4   :  { %1477 = vpow2.f32 %v1332_v17 }
0x10c5   :  { %1479 = vpow2.f32 %v1334_v20  ;;  %v1022_v27 = vor.u32 1.1754944e-38, %v1021_v23  ;;  %vm1020_vm3 = vcmp.eq.f32.partialorder %v1019_v24, 8.507059e+37 }
0x10c7   :  { %1126 = vrot.lane.b32.xlu1 %v1472_v13, %s1638_s16 }
0x10c9   :  { %v1476_v16 = vpop.eup %1475 }
0x10ca   :  { %v1011_v18 = vmul.f32 %v1476_v16, %v1008_v15  ;;  %v1478_v8 = vpop.eup %1477  ;;  %vm1016_vm9 = vweird.f32 %v1476_v16 }
0x10cb   :  { %v1009_v21 = vadd.f32 1.0, %v1478_v8  ;;  %vm1017_vm2 = vmor %vm1015_vm1, %vm1016_vm9  ;;  %v1480_v26 = vpop.eup %1479  ;;  %vm1178_vm1 = vcmask 1040384  }
0x10cc   :  { %v1012_v11 = vsub.f32 1.0, %v1011_v18  ;;  %v1089_v30 = vadd.f32 1.0, %v1480_v26 }
0x10cd   :  { %1481 = vrcp.f32 %v1009_v21  ;;  %v1036_v40 = vand.u32 2147483648, %v1009_v21  ;;  %vm1030_vm5 = vweird.f32 %v1009_v21  ;;  %v1034_v41 = vand.u32 2147483647, %v1009_v21 }
0x10ce   :  { %v1013_v1 = vmul.f32 %v1476_v16, %v1012_v11  ;;  %1483 = vrcp.f32 %v1089_v30  ;;  %vm1110_vm8 = vweird.f32 %v1089_v30  ;;  %v1116_v47 = vand.u32 2147483648, %v1089_v30 }
0x10cf   :  { %v1037_v44 = vor.u32 1.1754944e-38, %v1036_v40  ;;  %vm1035_vm7 = vcmp.eq.f32.partialorder %v1034_v41, 8.507059e+37  ;;  %v1114_v54 = vand.u32 2147483647, %v1089_v30  ;;  %1485 = vtanh.f32 %v1885_v5  ;;  %v1211_v40 = vld [vmem:[#allocation8 + $0x28] sm:$0xff]  ;;  %v1210_v41 = vld [vmem:[#allocation8 + $0x20] sm:$0xff] }
0x10d0   :  { %v1014_v22 = vadd.f32 %v1476_v16, %v1013_v1  ;;  %v1117_v60 = vor.u32 1.1754944e-38, %v1116_v47 }
0x10d1   :  { %vm1115_vm12 = vcmp.eq.f32.partialorder %v1114_v54, 8.507059e+37 }
0x10d2   :  { %v1018_v25 = vsel %vm1017_vm2, %v1476_v16, %v1014_v22  ;;  %vm1182_vm2 = vcmask 523264  }
0x10d3   :  { %v1936_v29 = vsel %vm1020_vm3, %v1022_v27, %v1018_v25  ;;  %v1482_v32 = vpop.eup %1481 }
0x10d4   :  { %v1026_v33 = vmul.f32 %v1482_v32, %v1009_v21  ;;  %v1484_v35 = vpop.eup %1483  ;;  %vm1031_vm4 = vweird.f32 %v1482_v32  ;;  %v1048_v0 = vmul.f32 %v1044_v53, %v1936_v29  ;;  %v1246_v53 = vld [vmem:[%s2008_s8 + $0x20] sm:$0xff] }
0x10d5   :  { %v1106_v37 = vmul.f32 %v1484_v35, %v1089_v30  ;;  %vm1032_vm6 = vmor %vm1030_vm5, %vm1031_vm4  ;;  %vm1111_vm10 = vweird.f32 %v1484_v35  ;;  %v1486_v63 = vpop.eup %1485 }
0x10d6   :  { %v1027_v34 = vsub.f32 1.0, %v1026_v33  ;;  %vm1112_vm11 = vmor %vm1110_vm8, %vm1111_vm10  ;;  %v1168_v33 = vld [vmem:[#allocation7 + $0x20] sm:$0xff] }
0x10d7   :  { %v1107_v39 = vsub.f32 1.0, %v1106_v37  ;;  %v1164_v37 = vld [vmem:[#allocation7] sm:$0xff] }
0x10d8   :  { %v1028_v36 = vmul.f32 %v1482_v32, %v1027_v34  ;;  %v1167_v34 = vld [vmem:[#allocation7 + $0x18] sm:$0xff] }
0x10d9   :  { %v1108_v43 = vmul.f32 %v1484_v35, %v1107_v39  ;;  %v1212_v39 = vld [vmem:[#allocation8 + $0x30] sm:$0xff] }
0x10da   :  { %v1029_v38 = vadd.f32 %v1482_v32, %v1028_v36  ;;  %v1165_v36 = vld [vmem:[#allocation7 + $0x8] sm:$0xff] }
0x10db   :  { %v1109_v49 = vadd.f32 %v1484_v35, %v1108_v43 }
0x10dc   :  { %v1033_v42 = vsel %vm1032_vm6, %v1482_v32, %v1029_v38  ;;  %v1170_v32 = vld [vmem:[#allocation7 + $0x30] sm:$0xff]  ;;  %v1213_v38 = vld [vmem:[#allocation8 + $0x38] sm:$0xff] }
0x10dd   :  { %v1940_v46 = vsel %vm1035_vm7, %v1037_v44, %v1033_v42  ;;  %v1113_v55 = vsel %vm1112_vm11, %v1484_v35, %v1109_v49  ;;  %v1166_v35 = vld [vmem:[#allocation7 + $0x10] sm:$0xff]  ;;  %1229 = vmatpush.msra.mxu1 %v1213_v38  ;;  %v1209_v42 = vld [vmem:[#allocation8 + $0x18] sm:$0xff] }
0x10de   :  { %v1118_v52 = vsel %vm1115_vm12, %v1117_v60, %v1113_v55  ;;  %v1049_v12 = vmul.f32 %v1045_v9, %v1940_v46  ;;  %v1208_v55 = vld [vmem:[#allocation8 + $0x10] sm:$0xff] }
0x10df   :  { %1230 = vmatpush.msra.mxu1 %v1212_v39 }
0x10e1   :  { %1231 = vmatpush.msra.mxu1 %v1211_v40 }
0x10e3   :  { %1232 = vmatpush.msra.mxu1 %v1210_v41 }
0x10e5   :  { %1233 = vmatpush.msra.mxu1 %v1209_v42 }
0x10e7   :  { %1234 = vmatpush.msra.mxu1 %v1208_v55 }
0x1118   :  { %v1053_v28 = vpop.permute.xlu2 %1052 }
0x1119   :  { %v1058_v31 = vmul.f32 %v1053_v28, %v1936_v29 }
0x111b   :  { %1062 = vrot.lane.b32.xlu2 %v1058_v31, %s1638_s16  ;;  %v1171_v31 = vld [vmem:[#allocation7 + $0x38] sm:$0xff] }
0x111c   :  { %1193 = vmatpush.msra.mxu0 %v1171_v31 }
0x111e   :  { %1194 = vmatpush.msra.mxu0 %v1170_v32 }
0x1131   :  { %v1055_v45 = vpop.permute.xlu1 %1054 }
0x1132   :  { %v1059_v48 = vmul.f32 %v1055_v45, %v1940_v46 }
0x1134   :  { %1064 = vrot.lane.b32.xlu0 %v1059_v48, %s1638_s16 }
0x1139   :  { %v1127_v51 = vpop.permute.xlu1 %1126 }
0x113a   :  { %v1131_v58 = vmul.f32 %v1127_v51, %v1118_v52  ;;  %v1206_v51 = vld [vmem:[#allocation8] sm:$0xff] }
0x113c   :  { %1487 = vtanh.f32 %v1131_v58  ;;  %1124 = vrot.lane.b32.xlu0 %v1486_v63, %s1638_s16  ;;  %v1249_v58 = vld [vmem:[%s2008_s8 + $0x38] sm:$0xff]  ;;  %v1248_v63 = vld [vmem:[%s2008_s8 + $0x30] sm:$0xff] }
0x113d   :  { %1261 = vmatpush.msrb.mxu2 %v1249_v58 }
0x113f   :  { %1262 = vmatpush.msrb.mxu2 %v1248_v63 }
0x1142   :  { %v1488_v56 = vpop.eup %1487 }
0x1143   :  { %1138 = vrot.lane.b32.xlu2 %v1488_v56, %s1639_s2  ;;  %v1247_v56 = vld [vmem:[%s2008_s8 + $0x28] sm:$0xff] }
0x1144   :  { %1263 = vmatpush.msrb.mxu2 %v1247_v56 }
0x1146   :  { %1264 = vmatpush.msrb.mxu2 %v1246_v53 }
0x1175   :  { %v1063_v2 = vpop.permute.xlu2 %1062 }
0x1176   :  { %v1068_v4 = vadd.f32 %v1063_v2, %v1048_v0  ;;  %v1245_v0 = vld [vmem:[%s2008_s8 + $0x18] sm:$0xff]  ;;  %v1353_v2 = vld [vmem:[%s2005_s5] ss:$0 sm:$0xff] }
0x1177   :  { %1265 = vmatpush.msrb.mxu2 %v1245_v0 }
0x1178   :  { %1489 = vtanh.f32 %v1068_v4 }
0x1179   :  { %1491 = vpow2.f32 %v1333_v57 }
0x117e   :  { %v1490_v62 = vpop.eup %1489 }
0x117f   :  { %1074 = vrot.lane.b32.xlu0 %v1490_v62, %s1638_s16  ;;  %v1492_v59 = vpop.eup %1491 }
0x1180   :  { %v1088_v6 = vadd.f32 1.0, %v1492_v59  ;;  %v1244_v59 = vld [vmem:[%s2008_s8 + $0x10] sm:$0xff] }
0x1181   :  { %1266 = vmatpush.msrb.mxu2 %v1244_v59 }
0x1182   :  { %1493 = vrcp.f32 %v1088_v6  ;;  %vm1095_vm13 = vweird.f32 %v1088_v6  ;;  %v1101_v14 = vand.u32 2147483648, %v1088_v6  ;;  %v1099_v16 = vand.u32 2147483647, %v1088_v6 }
0x1184   :  { %v1102_v5 = vor.u32 1.1754944e-38, %v1101_v14  ;;  %vm1100_vm9 = vcmp.eq.f32.partialorder %v1099_v16, 8.507059e+37 }
0x1188   :  { %v1494_v10 = vpop.eup %1493 }
0x1189   :  { %v1091_v3 = vmul.f32 %v1494_v10, %v1088_v6  ;;  %vm1096_vm14 = vweird.f32 %v1494_v10  ;;  %v1243_v6 = vld [vmem:[%s2008_s8 + $0x8] sm:$0xff] }
0x118a   :  { %vm1097_vm15 = vmor %vm1095_vm13, %vm1096_vm14  ;;  %1267 = vmatpush.msrb.mxu2 %v1243_v6 }
0x118b   :  { %v1092_v7 = vsub.f32 1.0, %v1091_v3  ;;  %v1354_v3 = vld [vmem:[%s2007_s7] ss:$0 sm:$0xff]  ;;  %s1641_s7 = smov [#allocation10]  }
0x118d   :  { %v1093_v50 = vmul.f32 %v1494_v10, %v1092_v7 }
0x118f   :  { %v1094_v15 = vadd.f32 %v1494_v10, %v1093_v50 }
0x1191   :  { %v1098_v17 = vsel %vm1097_vm15, %v1494_v10, %v1094_v15  ;;  %v1242_v10 = vld [vmem:[%s2008_s8] sm:$0xff]  ;;  %s1292_s8 = sshll.u32 %s1641_s7, 4  ;;  %s1293_s8 = int_to_ptr.vmem [resolvable:$true] %s1292_s8 }
0x1192   :  { %v1103_v18 = vsel %vm1100_vm9, %v1102_v5, %v1098_v17  ;;  %1268 = vmatpush.msrb.mxu2 %v1242_v10 }
0x119d   :  { %v1139_v22 = vpop.permute.xlu2 %1138 }
0x119e   :  { %v1143_v23 = vmul.f32 %v1139_v22, %v1118_v52  ;;  %v1207_v52 = vld [vmem:[#allocation8 + $0x8] sm:$0xff] }
0x119f   :  { %1235 = vmatpush.msra.mxu1 %v1207_v52 }
0x11a0   :  { %v1155_v24 = vrot.slane %v1143_v23, 7 }
0x11a1   :  { %1236 = vmatpush.msra.mxu1 %v1206_v51 }
0x11a6   :  { %v1065_v13 = vpop.permute.xlu0 %1064 }
0x11a7   :  { %v1069_v19 = vadd.f32 %v1065_v13, %v1049_v12 }
0x11a9   :  { %1495 = vtanh.f32 %v1069_v19 }
0x11ae   :  { %v1125_v11 = vpop.permute.xlu0 %1124 }
0x11af   :  { %v1496_v20 = vpop.eup %1495  ;;  %v1130_v1 = vmul.f32 %v1125_v11, %v1103_v18 }
0x11b0   :  { %1076 = vrot.lane.b32.xlu1 %v1496_v20, %s1638_s16 }
0x11b1   :  { %1497 = vtanh.f32 %v1130_v1 }
0x11b7   :  { %v1498_v61 = vpop.eup %1497 }
0x11b8   :  { %1136 = vrot.lane.b32.xlu1 %v1498_v61, %s1639_s2 }
0x11f1   :  { %v1075_v8 = vpop.permute.xlu0 %1074 }
0x11f2   :  { %v1080_v21 = vmul.f32 %v1075_v8, %v1936_v29  ;;  %v1169_v29 = vld [vmem:[#allocation7 + $0x28] sm:$0xff] }
0x11f3   :  { %1195 = vmatpush.msra.mxu0 %v1169_v29 }
0x11f4   :  { %1147 = vrot.lane.b32.xlu2 %v1080_v21, %s1639_s2 }
0x11f5   :  { %1196 = vmatpush.msra.mxu0 %v1168_v33 }
0x11f7   :  { %1197 = vmatpush.msra.mxu0 %v1167_v34 }
0x11f9   :  { %1198 = vmatpush.msra.mxu0 %v1166_v35 }
0x11fb   :  { %1199 = vmatpush.msra.mxu0 %v1165_v36 }
0x11fc   :  { %1158 = vrot.lane.b32.xlu2 %v1155_v24, %s1640_s1 }
0x11fd   :  { %1200 = vmatpush.msra.mxu0 %v1164_v37 }
0x1222   :  { %v1077_v25 = vpop.permute.xlu1 %1076 }
0x1223   :  { %v1081_v26 = vmul.f32 %v1077_v25, %v1940_v46 }
0x1225   :  { %v1146_v27 = vrot.slane %v1081_v26, 7 }
0x1227   :  { %1149 = vrot.lane.b32.xlu0 %v1146_v27, %s1639_s2 }
0x122a   :  { %v1137_v28 = vpop.permute.xlu1 %1136 }
0x122b   :  { %v1142_v30 = vmul.f32 %v1137_v28, %v1103_v18 }
0x122d   :  { %1156 = vrot.lane.b32.xlu1 %v1142_v30, %s1640_s1 }
0x124e   :  { %v1148_v43 = vpop.permute.xlu2 %1147 }
0x1256   :  { %v1159_v45 = vpop.permute.xlu2 %1158 }
0x1299   :  { %v1150_v44 = vpop.permute.xlu0 %1149 }
0x129a   :  { %v1163_v46 = vsel %vm112_vm0, %v1150_v44, %v1159_v45 }
0x129b   :  { %v1180_v49 = vrot.slane %v1163_v46, 7 }
0x129f   :  { %v1157_v47 = vpop.permute.xlu1 %1156 }
0x12a0   :  { %v1162_v48 = vsel %vm112_vm0, %v1148_v43, %v1157_v47  ;;  %vm1273_vm0 = vcmask 25600  }
0x12a1   :  { %v1179_v54 = vrot.slane %v1162_v48, 7 }
0x12a3   :  { %v1181_v60 = vsel %vm1178_vm1, %v1179_v54, %v1180_v49 }
0x12a4   :  { %1335 = vmatmul.msk.f32.vlgmr.msra.gmra.mxu0 %vm1182_vm2, %v1181_v60 }
0x1321   :  { %v1202_v4 = vpop.f32.mrf.mxu0 }
0x1322   :  { %v1203_v62 = vadd.f32 %v1353_v2, %v1202_v4 }
0x1324   :  { %v1205_v57 = vmax.f32 %v1203_v62, 0.0 }
0x1326   :  { %1336 = vmatmul.msk.f32.vlgmr.msra.gmra.mxu1 %vm1182_vm2, %v1205_v57 }
0x13a3   :  { %v1238_v7 = vpop.f32.mrf.mxu1 }
0x13a4   :  { %v1239_v9 = vadd.f32 %v1354_v3, %v1238_v7 }
0x13a6   :  { %v1241_v50 = vmax.f32 %v1239_v9, 0.0 }
0x13a8   :  { %1337 = vmatmul.msk.f32.vlgmr.msrb.gmra.mxu2 %vm1182_vm2, %v1241_v50 }
0x142b   :  { %v1270_v12 = vpop.f32.mrf.mxu2 }
0x142c   :  { %v1274_v13 = vsel %vm1273_vm0, %v1270_v12, -inf }
0x142d   :  { %1275 = vmax.xlane.f32.xlu0 %v1274_v13 }
0x14a0   :  { %v1276_v14 = vpop.xlane.xlu0 %1275 }
0x14a1   :  { %v1277_v19 = vsub.f32 %v1270_v12, %v1276_v14 }
0x14a3   :  { %v1278_v15 = vmul.f32 1.442695, %v1277_v19 }
0x14a5   :  { %1499 = vpow2.f32 %v1278_v15 }
0x14ab   :  { %v1500_v16 = vpop.eup %1499 }
0x14ac   :  { %v1280_v5 = vsel %vm1273_vm0, %v1500_v16, 0.0 }
0x14ad   :  { %1281 = vadd.xlane.f32.xlu1 %v1280_v5 }
0x1520   :  { %v1282_v17 = vpop.xlane.xlu1 %1281 }
0x1521   :  { %1501 = vlog2.f32 %v1282_v17 }
0x1527   :  { %v1502_v18 = vpop.eup %1501 }
0x1528   :  { %v1284_v11 = vmul.f32 0.6931472, %v1502_v18 }
0x152a   :  { %v1285_v20 = vsub.f32 %v1277_v19, %v1284_v11 }
0x152c   :  { %1286 = vst.msk [vmem:[#allocation10] sm:$0x3] %vm1273_vm0, %v1285_v20 }
0x152d   :  { %1297 = dma.vmem_to_hbm [thread:$0]  %s1293_s8, 32, %s1295_s20, [#allocation4]  }
0x152e   :  { %1629 = dma.done.wait [#allocation4], 32  }
0x152f   :  { %1630 = vsyncadd [#allocation4], 4294967264 }
0x1530   :  { %1302 = vsyncpa [#allocation3], 1 }
0x1531   :  { %1303 = vsyncpa [#allocation6], 1 }
0x1532   :  { %1304 = vsyncpa [#allocation9], 1 }
0x1533   :  { %1305 = vsyncpa [#allocation4], 1 }

</bundles_post_ra>
